<compile_context>
chip_gen: v6e
topology: v6e:2x2x1
jax: 0.10.0
libtpu: 0.0.40
codegen_flags: <defaults>
</compile_context>

<pallas_src>
import functools
import math

import jax
import jax.numpy as jnp
from jax import lax
from jax.experimental import pallas as pl
from jax.experimental.pallas import tpu as pltpu

_INV_SQRT2 = 1.0 / math.sqrt(2.0)
_GELU_C = math.sqrt(2.0 / math.pi)
_LN_EPS = 1e-5


def _gelu_tanh(x):
    # tanh-form GELU: tanh goes to the EUP instead of a long erf VPU
    # polynomial.  Deviates from torch's exact-erf GELU by <~5e-4 abs.
    return 0.5 * x * (1.0 + jnp.tanh(_GELU_C * (x + 0.044715 * (x * x * x))))


def _gelu_exact(x):
    # exact (erf) GELU, matching torch.nn.GELU() default -- reference only.
    return 0.5 * x * (1.0 + lax.erf(x * _INV_SQRT2))


def _ln(x, g, b):
    mu = jnp.mean(x, axis=-1, keepdims=True)
    xc = x - mu
    var = jnp.mean(xc * xc, axis=-1, keepdims=True)
    return xc * lax.rsqrt(var + _LN_EPS) * g + b


# --------------------------------------------------------------------------
# Kernel
# --------------------------------------------------------------------------
def msaf_kernel(x_ref, mat_ref, vec_ref, out_ref, *, meta):
    B, S, E = meta["B"], meta["S"], meta["E"]
    H, Q = E // 2, E // 4
    BS = B * S
    mo = meta["mat_offsets"]     # name -> (row_start, n_rows, n_cols)
    vo = meta["vec_rows"]        # name -> (row, width)

    def mat(name):
        r0, nr, nc = mo[name]
        return mat_ref[r0:r0 + nr, 0:nc]

    # Load the whole vec slab once (a couple of vregs) and slice in-register.
    vslab = vec_ref[...]

    def vec(name):
        r, w = vo[name]
        return vslab[r:r + 1, 0:w]

    x = x_ref[...]                       # (2*BS, E): [av rows | txt rows]

    # TODO(synk): SequenceAlignmentModule / MultiModalFusionEncoder /
    # BERTTextLSTMNet / AttentionVisualizer are not defined in the reference
    # source, so the alignment / cross / self transformer stages are identity.
    normed = _ln(x, vec("ln_g"), vec("ln_b"))     # one LN over all 32 rows
    av_f = normed[0:BS, :]
    txt_f = normed[BS:2 * BS, :]
    # all = result1 + av_feature + l_result + av_result -> 2 * (txt_f + av_f)
    allf = 2.0 * (txt_f + av_f)

    # ---- pooling['transform']: LN -> Linear(E, E/2) -> GELU -> Dropout(id)
    t = _ln(allf, vec("tln_g"), vec("tln_b"))
    h = _gelu_tanh(jnp.dot(t, mat("tw"), preferred_element_type=jnp.float32)
                   + vec("tb"))                                   # (BS, H)

    # ---- one fused MXU push: attention proj + all pyramid conv taps share h.
    # RHS column layout: [aw1 (64) | conv taps grouped by shift: +2,+1,0,-1,-2]
    big = jnp.dot(h, mat("w_big"), preferred_element_type=jnp.float32)

    # ---- pooling['attention']: Linear -> GELU -> Linear(width 1) -> Softmax.
    # The width-1 second linear is a VPU multiply + lane reduction.
    a1 = _gelu_tanh(big[:, 0:64] + vec("ab1"))                     # (BS, 64)
    logits = (jnp.sum(a1 * vec("aw2_t"), axis=-1, keepdims=True)
              + vec("ab2"))                                        # (BS, 1)

    # ---- pyramid convs (levels 1/2; 3/4 are dead code): align each shift
    # group with a sublane roll (XLU) times a precomputed 0/1 validity column.
    masks = mat("masks")                                           # (BS, 4)

    def shifted(z, k, mcol):
        rolled = pltpu.roll(z, k % BS, 0)          # rolled[r] = z[(r-k) % BS]
        return rolled * masks[:, mcol:mcol + 1]    # zero cross-sequence rows

    c0 = 64
    g_p2 = shifted(big[:, c0:c0 + Q], 2, 0)                  # w2 tap0
    g_p1 = shifted(big[:, c0 + Q:c0 + 3 * Q], 1, 1)          # w1 t0 | w2 t1
    g_00 = big[:, c0 + 3 * Q:c0 + 5 * Q]                     # w1 t1 | w2 t2
    g_m1 = shifted(big[:, c0 + 5 * Q:c0 + 7 * Q], -1, 2)     # w1 t2 | w2 t3
    g_m2 = shifted(big[:, c0 + 7 * Q:c0 + 8 * Q], -2, 3)     # w2 tap4
    conv1 = g_p1[:, 0:Q] + g_00[:, 0:Q] + g_m1[:, 0:Q]                # (BS,Q)
    conv2 = (g_p2 + g_p1[:, Q:2 * Q] + g_00[:, Q:2 * Q]
             + g_m1[:, Q:2 * Q] + g_m2)                               # (BS,Q)

    # ---- per-sequence reductions on tile-aligned (S, .) row blocks
    attn_rows, max_rows, avg_rows, p1_rows, p2_rows = [], [], [], [], []
    inv_s = 1.0 / S
    for b in range(B):
        lo = b * S
        h_b = h[lo:lo + S, :]
        lg = logits[lo:lo + S, :]
        lg = lg - jnp.max(lg, axis=0, keepdims=True)
        ew = jnp.exp(lg)
        wts = ew * pl.reciprocal(jnp.sum(ew, axis=0, keepdims=True),
                                 approx=True)
        attn_rows.append(jnp.sum(wts * h_b, axis=0, keepdims=True))
        max_rows.append(jnp.max(h_b, axis=0, keepdims=True))
        avg_rows.append(jnp.sum(h_b, axis=0, keepdims=True) * inv_s)
        p1_rows.append(jnp.max(conv1[lo:lo + S, :], axis=0, keepdims=True))
        p2_rows.append(jnp.max(conv2[lo:lo + S, :], axis=0, keepdims=True))

    def stack(rows):
        return rows[0] if len(rows) == 1 else jnp.concatenate(rows, axis=0)

    attn_pooled = stack(attn_rows)                                 # (B, H)
    max_pooled = stack(max_rows)                                   # (B, H)
    avg_pooled = stack(avg_rows)                                   # (B, H)
    p1 = stack(p1_rows) + vec("b1")        # conv bias commutes with max-pool
    p2 = stack(p2_rows) + vec("b2")                                # (B, Q)

    # ---- pooling['channel_attn']
    c1 = _gelu_tanh(jnp.dot(avg_pooled, mat("cw1"),
                            preferred_element_type=jnp.float32) + vec("cb1"))
    chw = jax.nn.sigmoid(jnp.dot(c1, mat("cw2"),
                                 preferred_element_type=jnp.float32)
                         + vec("cb2"))
    enhanced = attn_pooled * chw + 0.2 * (max_pooled + avg_pooled)  # (B, H)

    # ---- pooling['fusion']: one matmul with the unsplit fw + one residual
    # store (the lane concat lives inside a single 128-lane vreg).
    pooled = jnp.concatenate([enhanced, p1, p2], axis=-1)           # (B, E)
    fpre = (jnp.dot(pooled, mat("fw"), preferred_element_type=jnp.float32)
            + vec("fb"))
    fused = _gelu_tanh(_ln(fpre, vec("fg"), vec("fbt")))
    out_ref[...] = fused + pooled


# --------------------------------------------------------------------------
# Parameter packing (runs ONCE, outside the per-call path)
# --------------------------------------------------------------------------
def _pad8(n):
    return ((n + 7) // 8) * 8


def pack_params(params, B, S):
    p = dict(params)
    E = p["tw"].shape[0]
    BS = B * S
    f32 = jnp.float32

    # fused RHS for the h-matmul; conv taps grouped by shift amount:
    #   [aw1 | +2: w2[0] | +1: w1[0],w2[1] | 0: w1[1],w2[2]
    #        | -1: w1[2],w2[3] | -2: w2[4]]
    w_big = jnp.concatenate(
        [p["aw1"],
         p["w2"][0],
         p["w1"][0], p["w2"][1],
         p["w1"][1], p["w2"][2],
         p["w1"][2], p["w2"][3],
         p["w2"][4]], axis=1).astype(f32)                 # (H, 64 + 8*(E//4))

    # 0/1 validity columns for the rolled tap groups (+2, +1, -1, -2):
    # row r (seq pos s = r % S) is valid for shift k iff 0 <= s - k < S.
    s = jnp.arange(BS) % S

    def valid(k):
        return ((s - k >= 0) & (s - k < S)).astype(f32)

    masks = jnp.stack([valid(2), valid(1), valid(-1), valid(-2)], axis=1)

    mats = [
        ("tw", p["tw"].astype(f32)),
        ("w_big", w_big),
        ("cw1", p["cw1"].astype(f32)),
        ("cw2", p["cw2"].astype(f32)),
        ("fw", p["fw"].astype(f32)),
        ("masks", masks),
    ]
    matw = 128 * pl.cdiv(max(m.shape[1] for _, m in mats), 128)
    blocks, mat_offsets, off = [], {}, 0
    for name, m in mats:
        r, c = m.shape
        blocks.append(jnp.pad(m, ((0, _pad8(r) - r), (0, matw - c))))
        mat_offsets[name] = (off, r, c)
        off += _pad8(r)
    mat_slab = jnp.concatenate(blocks, axis=0)            # single concat

    vecs = [
        ("ln_g", p["ln_g"]), ("ln_b", p["ln_b"]),
        ("tln_g", p["tln_g"]), ("tln_b", p["tln_b"]),
        ("tb", p["tb"]),
        ("b1", p["b1"]), ("b2", p["b2"]),
        ("ab1", p["ab1"]), ("aw2_t", p["aw2"].T), ("ab2", p["ab2"]),
        ("cb1", p["cb1"]), ("cb2", p["cb2"]),
        ("fb", p["fb"]), ("fg", p["fg"]), ("fbt", p["fbt"]),
    ]
    vecw = 128 * pl.cdiv(max(v.shape[-1] for _, v in vecs), 128)
    vblocks, vec_rows = [], {}
    for i, (name, v) in enumerate(vecs):
        v2 = v.reshape(1, -1).astype(f32)
        vblocks.append(jnp.pad(v2, ((0, 0), (0, vecw - v2.shape[1]))))
        vec_rows[name] = (i, v2.shape[1])
    pad_rows = _pad8(len(vecs)) - len(vecs)
    if pad_rows:
        vblocks.append(jnp.zeros((pad_rows, vecw), f32))
    vec_slab = jnp.concatenate(vblocks, axis=0)           # single concat

    meta = dict(B=B, S=S, E=E, mat_offsets=mat_offsets, vec_rows=vec_rows)
    return mat_slab, vec_slab, meta


# --------------------------------------------------------------------------
# Wrapper: pack once, return a jitted forward
# --------------------------------------------------------------------------
def make_msaf_forward(params, B, S):
    mat_slab, vec_slab, meta = pack_params(params, B, S)
    E = meta["E"]
    BS = B * S
    kernel = functools.partial(msaf_kernel, meta=meta)

    # Single grid step: the whole problem is a few vregs; a multi-step grid
    # would be dominated by per-step overhead.  (For much larger B on v7x a
    # 2-way "parallel" leading axis would keep both TensorCores busy.)
    call = pl.pallas_call(
        kernel,
        out_shape=jax.ShapeDtypeStruct((B, E), jnp.float32),
        grid=(1,),
        in_specs=[
            pl.BlockSpec((2 * BS, E), lambda i: (0, 0)),
            pl.BlockSpec(mat_slab.shape, lambda i: (0, 0)),
            pl.BlockSpec(vec_slab.shape, lambda i: (0, 0)),
        ],
        out_specs=pl.BlockSpec((B, E), lambda i: (0, 0)),
        compiler_params=pltpu.CompilerParams(
            dimension_semantics=("arbitrary",)),
    )

    @jax.jit
    def forward(av, txt, attention_mask=None):
        # attention_mask only feeds the (absent) BERT text branch.
        del attention_mask
        # Stack av and txt along the sublane axis -> one input DMA, one LN.
        x = jnp.concatenate(
            [av.reshape(BS, E), txt.reshape(BS, E)], axis=0).astype(jnp.float32)
        return call(x, mat_slab, vec_slab)

    return forward


# --------------------------------------------------------------------------
# Parameters + pure-JAX reference (mirrors the original math)
# --------------------------------------------------------------------------
def init_params(key, E):
    H, Q, E8 = E // 2, E // 4, E // 8
    ks = jax.random.split(key, 16)
    n = lambda k, shape, s=0.02: (s * jax.random.normal(k, shape)).astype(jnp.float32)
    ones = lambda shape: jnp.ones(shape, jnp.float32)
    zeros = lambda shape: jnp.zeros(shape, jnp.float32)
    return [
        ("ln_g", ones((1, E))), ("ln_b", zeros((1, E))),
        ("tln_g", ones((1, E))), ("tln_b", zeros((1, E))),
        ("tw", n(ks[0], (E, H))), ("tb", n(ks[1], (1, H))),
        # conv weights stored per-tap, already transposed: (k, in_ch, out_ch)
        ("w1", n(ks[2], (3, H, Q))), ("b1", n(ks[3], (1, Q))),
        ("w2", n(ks[4], (5, H, Q))), ("b2", n(ks[5], (1, Q))),
        ("aw1", n(ks[6], (H, 64))), ("ab1", n(ks[7], (1, 64))),
        ("aw2", n(ks[8], (64, 1))), ("ab2", n(ks[9], (1, 1))),
        ("cw1", n(ks[10], (H, E8))), ("cb1", n(ks[11], (1, E8))),
        ("cw2", n(ks[12], (E8, H))), ("cb2", n(ks[13], (1, H))),
        ("fw", n(ks[14], (E, E))), ("fb", n(ks[15], (1, E))),
        ("fg", ones((1, E))), ("fbt", zeros((1, E))),
    ]


def msaf_reference(av, txt, params):
    """Pure-JAX mirror of the original forward math (identity stubs, erf GELU)."""
    p = dict(params)
    av_f = _ln(av, p["ln_g"][0], p["ln_b"][0])
    txt_f = _ln(txt, p["ln_g"][0], p["ln_b"][0])
    allf = 2.0 * (txt_f + av_f)
    t = _ln(allf, p["tln_g"][0], p["tln_b"][0])
    h = _gelu_exact(t @ p["tw"] + p["tb"][0])                  # (B, S, H)
    S = h.shape[1]

    def conv_max(w, b, k):
        pad = (k - 1) // 2
        xp = jnp.pad(h, ((0, 0), (pad, pad), (0, 0)))
        acc = sum(xp[:, j:j + S, :] @ w[j] for j in range(k)) + b[0]
        return jnp.max(acc, axis=1)

    p1 = conv_max(p["w1"], p["b1"], 3)
    p2 = conv_max(p["w2"], p["b2"], 5)
    a1 = _gelu_exact(h @ p["aw1"] + p["ab1"][0])
    logits = a1 @ p["aw2"] + p["ab2"][0]
    wts = jax.nn.softmax(logits, axis=1)
    attn_pooled = jnp.sum(wts * h, axis=1)
    max_pooled = jnp.max(h, axis=1)
    avg_pooled = jnp.mean(h, axis=1)
    c1 = _gelu_exact(avg_pooled @ p["cw1"] + p["cb1"][0])
    cw_ = jax.nn.sigmoid(c1 @ p["cw2"] + p["cb2"][0])
    enhanced = attn_pooled * cw_ + 0.2 * (max_pooled + avg_pooled)
    pooled = jnp.concatenate([enhanced, p1, p2], axis=-1)
    fused = _gelu_exact(_ln(pooled @ p["fw"] + p["fb"][0], p["fg"][0], p["fbt"][0]))
    return fused + pooled


if __name__ == "__main__":
    B, S, E = 2, 8, 32   # batch, seq, hidden_size (embed_dim)
    key = jax.random.PRNGKey(0)
    k_av, k_txt, k_p = jax.random.split(key, 3)
    av = jax.random.normal(k_av, (B, S, E), jnp.float32)
    txt = jax.random.normal(k_txt, (B, S, E), jnp.float32)
    attention_mask = jnp.ones((B, S), jnp.int32)   # unused (no BERT branch)
    params = init_params(k_p, E)

    forward = make_msaf_forward(params, B, S)      # packs params ONCE
    out = forward(av, txt, attention_mask)
    out = jax.block_until_ready(out)

    ref = msaf_reference(av, txt, params)
    assert out.shape == (B, E)
    assert bool(jnp.all(jnp.isfinite(out)))
    # tanh GELU (vs torch's exact erf), approx-reciprocal softmax and EUP
    # rsqrt move results by O(1e-3) at most.
    assert bool(jnp.allclose(out, ref, rtol=3e-3, atol=3e-3)), \
        float(jnp.max(jnp.abs(out - ref)))
    print("KERNEL_OK")
</pallas_src>

<mosaic_0001>
module attributes {stable_mosaic.version = 11 : i64} {
  func.func @msaf_kernel(%arg0: i32, %arg1: memref<32x32xf32, #tpu.memory_space<vmem>>, %arg2: memref<120x128xf32, #tpu.memory_space<vmem>>, %arg3: memref<16x128xf32, #tpu.memory_space<vmem>>, %arg4: memref<2x32xf32, #tpu.memory_space<vmem>>) attributes {dimension_semantics = [#tpu.dimension_semantics<arbitrary>], iteration_bounds = array<i64: 1>, scalar_prefetch = 0 : i64, scratch_operands = 0 : i64, tpu.core_type = #tpu.core_type<tc>, window_params = [{pipeline_mode = #tpu.pipeline_mode<synchronous>, transform_indices = @transform_0, window_bounds = array<i64: 32, 32>}, {pipeline_mode = #tpu.pipeline_mode<synchronous>, transform_indices = @transform_1, window_bounds = array<i64: 120, 128>}, {pipeline_mode = #tpu.pipeline_mode<synchronous>, transform_indices = @transform_2, window_bounds = array<i64: 16, 128>}, {pipeline_mode = #tpu.pipeline_mode<synchronous>, transform_indices = @transform_3, window_bounds = array<i64: 2, 32>}]} {
    %c0 = arith.constant 0 : index
    %c0_0 = arith.constant 0 : index
    %0 = vector.load %arg3[%c0, %c0_0] : memref<16x128xf32, #tpu.memory_space<vmem>>, vector<16x128xf32>
    %c0_1 = arith.constant 0 : index
    %c0_2 = arith.constant 0 : index
    %1 = vector.load %arg1[%c0_1, %c0_2] : memref<32x32xf32, #tpu.memory_space<vmem>>, vector<32x32xf32>
    %2 = vector.extract_strided_slice %0 {offsets = [0, 0], sizes = [1, 32], strides = [1, 1]} : vector<16x128xf32> to vector<1x32xf32>
    %3 = vector.extract_strided_slice %0 {offsets = [1, 0], sizes = [1, 32], strides = [1, 1]} : vector<16x128xf32> to vector<1x32xf32>
    %cst = arith.constant dense<0.000000e+00> : vector<32xf32>
    %4 = vector.multi_reduction <add>, %1, %cst [1] : vector<32x32xf32> to vector<32xf32>
    %5 = vector.shape_cast %4 : vector<32xf32> to vector<32x1xf32>
    %cst_3 = arith.constant 3.200000e+01 : f32
    %6 = vector.broadcast %cst_3 : f32 to vector<32x1xf32>
    %7 = arith.divf %5, %6 : vector<32x1xf32>
    %8 = vector.broadcast %7 : vector<32x1xf32> to vector<32x32xf32>
    %9 = arith.subf %1, %8 : vector<32x32xf32>
    %10 = arith.mulf %9, %9 : vector<32x32xf32>
    %cst_4 = arith.constant dense<0.000000e+00> : vector<32xf32>
    %11 = vector.multi_reduction <add>, %10, %cst_4 [1] : vector<32x32xf32> to vector<32xf32>
    %12 = vector.shape_cast %11 : vector<32xf32> to vector<32x1xf32>
    %cst_5 = arith.constant 3.200000e+01 : f32
    %13 = vector.broadcast %cst_5 : f32 to vector<32x1xf32>
    %14 = arith.divf %12, %13 : vector<32x1xf32>
    %cst_6 = arith.constant 9.99999974E-6 : f32
    %15 = vector.broadcast %cst_6 : f32 to vector<32x1xf32>
    %16 = arith.addf %14, %15 : vector<32x1xf32>
    %17 = math.rsqrt %16 : vector<32x1xf32>
    %18 = vector.broadcast %17 : vector<32x1xf32> to vector<32x32xf32>
    %19 = arith.mulf %9, %18 : vector<32x32xf32>
    %20 = vector.broadcast %2 : vector<1x32xf32> to vector<32x32xf32>
    %21 = arith.mulf %19, %20 : vector<32x32xf32>
    %22 = vector.broadcast %3 : vector<1x32xf32> to vector<32x32xf32>
    %23 = arith.addf %21, %22 : vector<32x32xf32>
    %24 = vector.extract_strided_slice %23 {offsets = [0, 0], sizes = [16, 32], strides = [1, 1]} : vector<32x32xf32> to vector<16x32xf32>
    %25 = vector.extract_strided_slice %23 {offsets = [16, 0], sizes = [16, 32], strides = [1, 1]} : vector<32x32xf32> to vector<16x32xf32>
    %26 = arith.addf %25, %24 : vector<16x32xf32>
    %cst_7 = arith.constant 2.000000e+00 : f32
    %27 = vector.broadcast %cst_7 : f32 to vector<16x32xf32>
    %28 = arith.mulf %27, %26 : vector<16x32xf32>
    %29 = vector.extract_strided_slice %0 {offsets = [2, 0], sizes = [1, 32], strides = [1, 1]} : vector<16x128xf32> to vector<1x32xf32>
    %30 = vector.extract_strided_slice %0 {offsets = [3, 0], sizes = [1, 32], strides = [1, 1]} : vector<16x128xf32> to vector<1x32xf32>
    %cst_8 = arith.constant dense<0.000000e+00> : vector<16xf32>
    %31 = vector.multi_reduction <add>, %28, %cst_8 [1] : vector<16x32xf32> to vector<16xf32>
    %32 = vector.shape_cast %31 : vector<16xf32> to vector<16x1xf32>
    %cst_9 = arith.constant 3.200000e+01 : f32
    %33 = vector.broadcast %cst_9 : f32 to vector<16x1xf32>
    %34 = arith.divf %32, %33 : vector<16x1xf32>
    %35 = vector.broadcast %34 : vector<16x1xf32> to vector<16x32xf32>
    %36 = arith.subf %28, %35 : vector<16x32xf32>
    %37 = arith.mulf %36, %36 : vector<16x32xf32>
    %cst_10 = arith.constant dense<0.000000e+00> : vector<16xf32>
    %38 = vector.multi_reduction <add>, %37, %cst_10 [1] : vector<16x32xf32> to vector<16xf32>
    %39 = vector.shape_cast %38 : vector<16xf32> to vector<16x1xf32>
    %cst_11 = arith.constant 3.200000e+01 : f32
    %40 = vector.broadcast %cst_11 : f32 to vector<16x1xf32>
    %41 = arith.divf %39, %40 : vector<16x1xf32>
    %cst_12 = arith.constant 9.99999974E-6 : f32
    %42 = vector.broadcast %cst_12 : f32 to vector<16x1xf32>
    %43 = arith.addf %41, %42 : vector<16x1xf32>
    %44 = math.rsqrt %43 : vector<16x1xf32>
    %45 = vector.broadcast %44 : vector<16x1xf32> to vector<16x32xf32>
    %46 = arith.mulf %36, %45 : vector<16x32xf32>
    %47 = vector.broadcast %29 : vector<1x32xf32> to vector<16x32xf32>
    %48 = arith.mulf %46, %47 : vector<16x32xf32>
    %49 = vector.broadcast %30 : vector<1x32xf32> to vector<16x32xf32>
    %50 = arith.addf %48, %49 : vector<16x32xf32>
    %c0_13 = arith.constant 0 : index
    %c0_14 = arith.constant 0 : index
    %51 = vector.load %arg2[%c0_13, %c0_14] : memref<120x128xf32, #tpu.memory_space<vmem>>, vector<32x16xf32>
    %cst_15 = arith.constant dense<0.000000e+00> : vector<16x16xf32>
    %52 = tpu.matmul %50, %51, %cst_15 {dimension_numbers = #tpu.dot_dimension_numbers<[1], [0], [0], [1], [0, 0, 1, 1], [], []>} : vector<16x32xf32>, vector<32x16xf32>, vector<16x16xf32> -> vector<16x16xf32>
    %53 = vector.extract_strided_slice %0 {offsets = [4, 0], sizes = [1, 16], strides = [1, 1]} : vector<16x128xf32> to vector<1x16xf32>
    %54 = vector.broadcast %53 : vector<1x16xf32> to vector<16x16xf32>
    %55 = arith.addf %52, %54 : vector<16x16xf32>
    %cst_16 = arith.constant 5.000000e-01 : f32
    %56 = vector.broadcast %cst_16 : f32 to vector<16x16xf32>
    %57 = arith.mulf %56, %55 : vector<16x16xf32>
    %58 = arith.mulf %55, %55 : vector<16x16xf32>
    %59 = arith.mulf %58, %55 : vector<16x16xf32>
    %cst_17 = arith.constant 4.471500e-02 : f32
    %60 = vector.broadcast %cst_17 : f32 to vector<16x16xf32>
    %61 = arith.mulf %60, %59 : vector<16x16xf32>
    %62 = arith.addf %55, %61 : vector<16x16xf32>
    %cst_18 = arith.constant 0.797884583 : f32
    %63 = vector.broadcast %cst_18 : f32 to vector<16x16xf32>
    %64 = arith.mulf %63, %62 : vector<16x16xf32>
    %65 = math.tanh %64 : vector<16x16xf32>
    %cst_19 = arith.constant 1.000000e+00 : f32
    %66 = vector.broadcast %cst_19 : f32 to vector<16x16xf32>
    %67 = arith.addf %66, %65 : vector<16x16xf32>
    %68 = arith.mulf %57, %67 : vector<16x16xf32>
    %c32 = arith.constant 32 : index
    %c0_20 = arith.constant 0 : index
    %69 = vector.load %arg2[%c32, %c0_20] : memref<120x128xf32, #tpu.memory_space<vmem>>, vector<16x128xf32>
    %cst_21 = arith.constant dense<0.000000e+00> : vector<16x128xf32>
    %70 = tpu.matmul %68, %69, %cst_21 {dimension_numbers = #tpu.dot_dimension_numbers<[1], [0], [0], [1], [0, 0, 1, 1], [], []>} : vector<16x16xf32>, vector<16x128xf32>, vector<16x128xf32> -> vector<16x128xf32>
    %71 = vector.extract_strided_slice %70 {offsets = [0, 0], sizes = [16, 64], strides = [1, 1]} : vector<16x128xf32> to vector<16x64xf32>
    %72 = vector.extract_strided_slice %0 {offsets = [7, 0], sizes = [1, 64], strides = [1, 1]} : vector<16x128xf32> to vector<1x64xf32>
    %73 = vector.broadcast %72 : vector<1x64xf32> to vector<16x64xf32>
    %74 = arith.addf %71, %73 : vector<16x64xf32>
    %cst_22 = arith.constant 5.000000e-01 : f32
    %75 = vector.broadcast %cst_22 : f32 to vector<16x64xf32>
    %76 = arith.mulf %75, %74 : vector<16x64xf32>
    %77 = arith.mulf %74, %74 : vector<16x64xf32>
    %78 = arith.mulf %77, %74 : vector<16x64xf32>
    %cst_23 = arith.constant 4.471500e-02 : f32
    %79 = vector.broadcast %cst_23 : f32 to vector<16x64xf32>
    %80 = arith.mulf %79, %78 : vector<16x64xf32>
    %81 = arith.addf %74, %80 : vector<16x64xf32>
    %cst_24 = arith.constant 0.797884583 : f32
    %82 = vector.broadcast %cst_24 : f32 to vector<16x64xf32>
    %83 = arith.mulf %82, %81 : vector<16x64xf32>
    %84 = math.tanh %83 : vector<16x64xf32>
    %cst_25 = arith.constant 1.000000e+00 : f32
    %85 = vector.broadcast %cst_25 : f32 to vector<16x64xf32>
    %86 = arith.addf %85, %84 : vector<16x64xf32>
    %87 = arith.mulf %76, %86 : vector<16x64xf32>
    %88 = vector.extract_strided_slice %0 {offsets = [8, 0], sizes = [1, 64], strides = [1, 1]} : vector<16x128xf32> to vector<1x64xf32>
    %89 = vector.broadcast %88 : vector<1x64xf32> to vector<16x64xf32>
    %90 = arith.mulf %87, %89 : vector<16x64xf32>
    %cst_26 = arith.constant dense<0.000000e+00> : vector<16xf32>
    %91 = vector.multi_reduction <add>, %90, %cst_26 [1] : vector<16x64xf32> to vector<16xf32>
    %92 = vector.shape_cast %91 : vector<16xf32> to vector<16x1xf32>
    %93 = vector.extract_strided_slice %0 {offsets = [9, 0], sizes = [1, 1], strides = [1, 1]} : vector<16x128xf32> to vector<1x1xf32>
    %94 = vector.broadcast %93 : vector<1x1xf32> to vector<16x1xf32>
    %95 = arith.addf %92, %94 : vector<16x1xf32>
    %c104 = arith.constant 104 : index
    %c0_27 = arith.constant 0 : index
    %96 = vector.load %arg2[%c104, %c0_27] : memref<120x128xf32, #tpu.memory_space<vmem>>, vector<16x4xf32>
    %97 = vector.extract_strided_slice %70 {offsets = [0, 64], sizes = [16, 8], strides = [1, 1]} : vector<16x128xf32> to vector<16x8xf32>
    %c2_i32 = arith.constant 2 : i32
    %98 = tpu.dynamic_rotate %97 by %c2_i32 dim 0 : vector<16x8xf32>, i32 -> vector<16x8xf32>
    %99 = vector.extract_strided_slice %96 {offsets = [0, 0], sizes = [16, 1], strides = [1, 1]} : vector<16x4xf32> to vector<16x1xf32>
    %100 = vector.broadcast %99 : vector<16x1xf32> to vector<16x8xf32>
    %101 = arith.mulf %98, %100 : vector<16x8xf32>
    %102 = vector.extract_strided_slice %70 {offsets = [0, 72], sizes = [16, 16], strides = [1, 1]} : vector<16x128xf32> to vector<16x16xf32>
    %c1_i32 = arith.constant 1 : i32
    %103 = tpu.dynamic_rotate %102 by %c1_i32 dim 0 : vector<16x16xf32>, i32 -> vector<16x16xf32>
    %104 = vector.extract_strided_slice %96 {offsets = [0, 1], sizes = [16, 1], strides = [1, 1]} : vector<16x4xf32> to vector<16x1xf32>
    %105 = vector.broadcast %104 : vector<16x1xf32> to vector<16x16xf32>
    %106 = arith.mulf %103, %105 : vector<16x16xf32>
    %107 = vector.extract_strided_slice %70 {offsets = [0, 88], sizes = [16, 16], strides = [1, 1]} : vector<16x128xf32> to vector<16x16xf32>
    %108 = vector.extract_strided_slice %70 {offsets = [0, 104], sizes = [16, 16], strides = [1, 1]} : vector<16x128xf32> to vector<16x16xf32>
    %c15_i32 = arith.constant 15 : i32
    %109 = tpu.dynamic_rotate %108 by %c15_i32 dim 0 : vector<16x16xf32>, i32 -> vector<16x16xf32>
    %110 = vector.extract_strided_slice %96 {offsets = [0, 2], sizes = [16, 1], strides = [1, 1]} : vector<16x4xf32> to vector<16x1xf32>
    %111 = vector.broadcast %110 : vector<16x1xf32> to vector<16x16xf32>
    %112 = arith.mulf %109, %111 : vector<16x16xf32>
    %113 = vector.extract_strided_slice %70 {offsets = [0, 120], sizes = [16, 8], strides = [1, 1]} : vector<16x128xf32> to vector<16x8xf32>
    %c14_i32 = arith.constant 14 : i32
    %114 = tpu.dynamic_rotate %113 by %c14_i32 dim 0 : vector<16x8xf32>, i32 -> vector<16x8xf32>
    %115 = vector.extract_strided_slice %96 {offsets = [0, 3], sizes = [16, 1], strides = [1, 1]} : vector<16x4xf32> to vector<16x1xf32>
    %116 = vector.broadcast %115 : vector<16x1xf32> to vector<16x8xf32>
    %117 = arith.mulf %114, %116 : vector<16x8xf32>
    %118 = vector.extract_strided_slice %106 {offsets = [0, 0], sizes = [16, 8], strides = [1, 1]} : vector<16x16xf32> to vector<16x8xf32>
    %119 = vector.extract_strided_slice %107 {offsets = [0, 0], sizes = [16, 8], strides = [1, 1]} : vector<16x16xf32> to vector<16x8xf32>
    %120 = arith.addf %118, %119 : vector<16x8xf32>
    %121 = vector.extract_strided_slice %112 {offsets = [0, 0], sizes = [16, 8], strides = [1, 1]} : vector<16x16xf32> to vector<16x8xf32>
    %122 = arith.addf %120, %121 : vector<16x8xf32>
    %123 = vector.extract_strided_slice %106 {offsets = [0, 8], sizes = [16, 8], strides = [1, 1]} : vector<16x16xf32> to vector<16x8xf32>
    %124 = arith.addf %101, %123 : vector<16x8xf32>
    %125 = vector.extract_strided_slice %107 {offsets = [0, 8], sizes = [16, 8], strides = [1, 1]} : vector<16x16xf32> to vector<16x8xf32>
    %126 = arith.addf %124, %125 : vector<16x8xf32>
    %127 = vector.extract_strided_slice %112 {offsets = [0, 8], sizes = [16, 8], strides = [1, 1]} : vector<16x16xf32> to vector<16x8xf32>
    %128 = arith.addf %126, %127 : vector<16x8xf32>
    %129 = arith.addf %128, %117 : vector<16x8xf32>
    %130 = vector.extract_strided_slice %68 {offsets = [0, 0], sizes = [8, 16], strides = [1, 1]} : vector<16x16xf32> to vector<8x16xf32>
    %131 = vector.extract_strided_slice %95 {offsets = [0, 0], sizes = [8, 1], strides = [1, 1]} : vector<16x1xf32> to vector<8x1xf32>
    %cst_28 = arith.constant dense<0xFF800000> : vector<1xf32>
    %132 = vector.multi_reduction <maximumf>, %131, %cst_28 [0] : vector<8x1xf32> to vector<1xf32>
    %133 = vector.shape_cast %132 : vector<1xf32> to vector<1x1xf32>
    %134 = vector.broadcast %133 : vector<1x1xf32> to vector<8x1xf32>
    %135 = arith.subf %131, %134 : vector<8x1xf32>
    %136 = math.exp %135 : vector<8x1xf32>
    %cst_29 = arith.constant dense<0.000000e+00> : vector<1xf32>
    %137 = vector.multi_reduction <add>, %136, %cst_29 [0] : vector<8x1xf32> to vector<1xf32>
    %138 = vector.shape_cast %137 : vector<1xf32> to vector<1x1xf32>
    %139 = tpu.reciprocal %138 {approx = true} : vector<1x1xf32> -> vector<1x1xf32>
    %140 = vector.broadcast %139 : vector<1x1xf32> to vector<8x1xf32>
    %141 = arith.mulf %136, %140 : vector<8x1xf32>
    %142 = vector.broadcast %141 : vector<8x1xf32> to vector<8x16xf32>
    %143 = arith.mulf %142, %130 : vector<8x16xf32>
    %cst_30 = arith.constant dense<0.000000e+00> : vector<16xf32>
    %144 = vector.multi_reduction <add>, %143, %cst_30 [0] : vector<8x16xf32> to vector<16xf32>
    %145 = vector.shape_cast %144 : vector<16xf32> to vector<1x16xf32>
    %cst_31 = arith.constant dense<0xFF800000> : vector<16xf32>
    %146 = vector.multi_reduction <maximumf>, %130, %cst_31 [0] : vector<8x16xf32> to vector<16xf32>
    %147 = vector.shape_cast %146 : vector<16xf32> to vector<1x16xf32>
    %cst_32 = arith.constant dense<0.000000e+00> : vector<16xf32>
    %148 = vector.multi_reduction <add>, %130, %cst_32 [0] : vector<8x16xf32> to vector<16xf32>
    %149 = vector.shape_cast %148 : vector<16xf32> to vector<1x16xf32>
    %cst_33 = arith.constant 1.250000e-01 : f32
    %150 = vector.broadcast %cst_33 : f32 to vector<1x16xf32>
    %151 = arith.mulf %149, %150 : vector<1x16xf32>
    %152 = vector.extract_strided_slice %122 {offsets = [0, 0], sizes = [8, 8], strides = [1, 1]} : vector<16x8xf32> to vector<8x8xf32>
    %cst_34 = arith.constant dense<0xFF800000> : vector<8xf32>
    %153 = vector.multi_reduction <maximumf>, %152, %cst_34 [0] : vector<8x8xf32> to vector<8xf32>
    %154 = vector.shape_cast %153 : vector<8xf32> to vector<1x8xf32>
    %155 = vector.extract_strided_slice %129 {offsets = [0, 0], sizes = [8, 8], strides = [1, 1]} : vector<16x8xf32> to vector<8x8xf32>
    %cst_35 = arith.constant dense<0xFF800000> : vector<8xf32>
    %156 = vector.multi_reduction <maximumf>, %155, %cst_35 [0] : vector<8x8xf32> to vector<8xf32>
    %157 = vector.shape_cast %156 : vector<8xf32> to vector<1x8xf32>
    %158 = vector.extract_strided_slice %68 {offsets = [8, 0], sizes = [8, 16], strides = [1, 1]} : vector<16x16xf32> to vector<8x16xf32>
    %159 = vector.extract_strided_slice %95 {offsets = [8, 0], sizes = [8, 1], strides = [1, 1]} : vector<16x1xf32> to vector<8x1xf32>
    %cst_36 = arith.constant dense<0xFF800000> : vector<1xf32>
    %160 = vector.multi_reduction <maximumf>, %159, %cst_36 [0] : vector<8x1xf32> to vector<1xf32>
    %161 = vector.shape_cast %160 : vector<1xf32> to vector<1x1xf32>
    %162 = vector.broadcast %161 : vector<1x1xf32> to vector<8x1xf32>
    %163 = arith.subf %159, %162 : vector<8x1xf32>
    %164 = math.exp %163 : vector<8x1xf32>
    %cst_37 = arith.constant dense<0.000000e+00> : vector<1xf32>
    %165 = vector.multi_reduction <add>, %164, %cst_37 [0] : vector<8x1xf32> to vector<1xf32>
    %166 = vector.shape_cast %165 : vector<1xf32> to vector<1x1xf32>
    %167 = tpu.reciprocal %166 {approx = true} : vector<1x1xf32> -> vector<1x1xf32>
    %168 = vector.broadcast %167 : vector<1x1xf32> to vector<8x1xf32>
    %169 = arith.mulf %164, %168 : vector<8x1xf32>
    %170 = vector.broadcast %169 : vector<8x1xf32> to vector<8x16xf32>
    %171 = arith.mulf %170, %158 : vector<8x16xf32>
    %cst_38 = arith.constant dense<0.000000e+00> : vector<16xf32>
    %172 = vector.multi_reduction <add>, %171, %cst_38 [0] : vector<8x16xf32> to vector<16xf32>
    %173 = vector.shape_cast %172 : vector<16xf32> to vector<1x16xf32>
    %cst_39 = arith.constant dense<0xFF800000> : vector<16xf32>
    %174 = vector.multi_reduction <maximumf>, %158, %cst_39 [0] : vector<8x16xf32> to vector<16xf32>
    %175 = vector.shape_cast %174 : vector<16xf32> to vector<1x16xf32>
    %cst_40 = arith.constant dense<0.000000e+00> : vector<16xf32>
    %176 = vector.multi_reduction <add>, %158, %cst_40 [0] : vector<8x16xf32> to vector<16xf32>
    %177 = vector.shape_cast %176 : vector<16xf32> to vector<1x16xf32>
    %cst_41 = arith.constant 1.250000e-01 : f32
    %178 = vector.broadcast %cst_41 : f32 to vector<1x16xf32>
    %179 = arith.mulf %177, %178 : vector<1x16xf32>
    %180 = vector.extract_strided_slice %122 {offsets = [8, 0], sizes = [8, 8], strides = [1, 1]} : vector<16x8xf32> to vector<8x8xf32>
    %cst_42 = arith.constant dense<0xFF800000> : vector<8xf32>
    %181 = vector.multi_reduction <maximumf>, %180, %cst_42 [0] : vector<8x8xf32> to vector<8xf32>
    %182 = vector.shape_cast %181 : vector<8xf32> to vector<1x8xf32>
    %183 = vector.extract_strided_slice %129 {offsets = [8, 0], sizes = [8, 8], strides = [1, 1]} : vector<16x8xf32> to vector<8x8xf32>
    %cst_43 = arith.constant dense<0xFF800000> : vector<8xf32>
    %184 = vector.multi_reduction <maximumf>, %183, %cst_43 [0] : vector<8x8xf32> to vector<8xf32>
    %185 = vector.shape_cast %184 : vector<8xf32> to vector<1x8xf32>
    %186 = tpu.concatenate %145, %173 in 0 : vector<1x16xf32>, vector<1x16xf32> -> vector<2x16xf32>
    %187 = tpu.concatenate %147, %175 in 0 : vector<1x16xf32>, vector<1x16xf32> -> vector<2x16xf32>
    %188 = tpu.concatenate %151, %179 in 0 : vector<1x16xf32>, vector<1x16xf32> -> vector<2x16xf32>
    %189 = tpu.concatenate %154, %182 in 0 : vector<1x8xf32>, vector<1x8xf32> -> vector<2x8xf32>
    %190 = vector.extract_strided_slice %0 {offsets = [5, 0], sizes = [1, 8], strides = [1, 1]} : vector<16x128xf32> to vector<1x8xf32>
    %191 = vector.broadcast %190 : vector<1x8xf32> to vector<2x8xf32>
    %192 = arith.addf %189, %191 : vector<2x8xf32>
    %193 = tpu.concatenate %157, %185 in 0 : vector<1x8xf32>, vector<1x8xf32> -> vector<2x8xf32>
    %194 = vector.extract_strided_slice %0 {offsets = [6, 0], sizes = [1, 8], strides = [1, 1]} : vector<16x128xf32> to vector<1x8xf32>
    %195 = vector.broadcast %194 : vector<1x8xf32> to vector<2x8xf32>
    %196 = arith.addf %193, %195 : vector<2x8xf32>
    %c48 = arith.constant 48 : index
    %c0_44 = arith.constant 0 : index
    %197 = vector.load %arg2[%c48, %c0_44] : memref<120x128xf32, #tpu.memory_space<vmem>>, vector<16x4xf32>
    %cst_45 = arith.constant dense<0.000000e+00> : vector<2x4xf32>
    %198 = tpu.matmul %188, %197, %cst_45 {dimension_numbers = #tpu.dot_dimension_numbers<[1], [0], [0], [1], [0, 0, 1, 1], [], []>} : vector<2x16xf32>, vector<16x4xf32>, vector<2x4xf32> -> vector<2x4xf32>
    %199 = vector.extract_strided_slice %0 {offsets = [10, 0], sizes = [1, 4], strides = [1, 1]} : vector<16x128xf32> to vector<1x4xf32>
    %200 = vector.broadcast %199 : vector<1x4xf32> to vector<2x4xf32>
    %201 = arith.addf %198, %200 : vector<2x4xf32>
    %cst_46 = arith.constant 5.000000e-01 : f32
    %202 = vector.broadcast %cst_46 : f32 to vector<2x4xf32>
    %203 = arith.mulf %202, %201 : vector<2x4xf32>
    %204 = arith.mulf %201, %201 : vector<2x4xf32>
    %205 = arith.mulf %204, %201 : vector<2x4xf32>
    %cst_47 = arith.constant 4.471500e-02 : f32
    %206 = vector.broadcast %cst_47 : f32 to vector<2x4xf32>
    %207 = arith.mulf %206, %205 : vector<2x4xf32>
    %208 = arith.addf %201, %207 : vector<2x4xf32>
    %cst_48 = arith.constant 0.797884583 : f32
    %209 = vector.broadcast %cst_48 : f32 to vector<2x4xf32>
    %210 = arith.mulf %209, %208 : vector<2x4xf32>
    %211 = math.tanh %210 : vector<2x4xf32>
    %cst_49 = arith.constant 1.000000e+00 : f32
    %212 = vector.broadcast %cst_49 : f32 to vector<2x4xf32>
    %213 = arith.addf %212, %211 : vector<2x4xf32>
    %214 = arith.mulf %203, %213 : vector<2x4xf32>
    %c64 = arith.constant 64 : index
    %c0_50 = arith.constant 0 : index
    %215 = vector.load %arg2[%c64, %c0_50] : memref<120x128xf32, #tpu.memory_space<vmem>>, vector<4x16xf32>
    %cst_51 = arith.constant dense<0.000000e+00> : vector<2x16xf32>
    %216 = tpu.matmul %214, %215, %cst_51 {dimension_numbers = #tpu.dot_dimension_numbers<[1], [0], [0], [1], [0, 0, 1, 1], [], []>} : vector<2x4xf32>, vector<4x16xf32>, vector<2x16xf32> -> vector<2x16xf32>
    %217 = vector.extract_strided_slice %0 {offsets = [11, 0], sizes = [1, 16], strides = [1, 1]} : vector<16x128xf32> to vector<1x16xf32>
    %218 = vector.broadcast %217 : vector<1x16xf32> to vector<2x16xf32>
    %219 = arith.addf %216, %218 : vector<2x16xf32>
    %220 = arith.negf %219 : vector<2x16xf32>
    %221 = math.exp %220 : vector<2x16xf32>
    %cst_52 = arith.constant 1.000000e+00 : f32
    %222 = vector.broadcast %cst_52 : f32 to vector<2x16xf32>
    %223 = arith.addf %222, %221 : vector<2x16xf32>
    %224 = arith.divf %222, %223 : vector<2x16xf32>
    %225 = arith.mulf %186, %224 : vector<2x16xf32>
    %226 = arith.addf %187, %188 : vector<2x16xf32>
    %cst_53 = arith.constant 2.000000e-01 : f32
    %227 = vector.broadcast %cst_53 : f32 to vector<2x16xf32>
    %228 = arith.mulf %227, %226 : vector<2x16xf32>
    %229 = arith.addf %225, %228 : vector<2x16xf32>
    %230 = tpu.concatenate %229, %192, %196 in 1 : vector<2x16xf32>, vector<2x8xf32>, vector<2x8xf32> -> vector<2x32xf32>
    %c72 = arith.constant 72 : index
    %c0_54 = arith.constant 0 : index
    %231 = vector.load %arg2[%c72, %c0_54] : memref<120x128xf32, #tpu.memory_space<vmem>>, vector<32x32xf32>
    %cst_55 = arith.constant dense<0.000000e+00> : vector<2x32xf32>
    %232 = tpu.matmul %230, %231, %cst_55 {dimension_numbers = #tpu.dot_dimension_numbers<[1], [0], [0], [1], [0, 0, 1, 1], [], []>} : vector<2x32xf32>, vector<32x32xf32>, vector<2x32xf32> -> vector<2x32xf32>
    %233 = vector.extract_strided_slice %0 {offsets = [12, 0], sizes = [1, 32], strides = [1, 1]} : vector<16x128xf32> to vector<1x32xf32>
    %234 = vector.broadcast %233 : vector<1x32xf32> to vector<2x32xf32>
    %235 = arith.addf %232, %234 : vector<2x32xf32>
    %236 = vector.extract_strided_slice %0 {offsets = [13, 0], sizes = [1, 32], strides = [1, 1]} : vector<16x128xf32> to vector<1x32xf32>
    %237 = vector.extract_strided_slice %0 {offsets = [14, 0], sizes = [1, 32], strides = [1, 1]} : vector<16x128xf32> to vector<1x32xf32>
    %cst_56 = arith.constant dense<0.000000e+00> : vector<2xf32>
    %238 = vector.multi_reduction <add>, %235, %cst_56 [1] : vector<2x32xf32> to vector<2xf32>
    %239 = vector.shape_cast %238 : vector<2xf32> to vector<2x1xf32>
    %cst_57 = arith.constant 3.200000e+01 : f32
    %240 = vector.broadcast %cst_57 : f32 to vector<2x1xf32>
    %241 = arith.divf %239, %240 : vector<2x1xf32>
    %242 = vector.broadcast %241 : vector<2x1xf32> to vector<2x32xf32>
    %243 = arith.subf %235, %242 : vector<2x32xf32>
    %244 = arith.mulf %243, %243 : vector<2x32xf32>
    %cst_58 = arith.constant dense<0.000000e+00> : vector<2xf32>
    %245 = vector.multi_reduction <add>, %244, %cst_58 [1] : vector<2x32xf32> to vector<2xf32>
    %246 = vector.shape_cast %245 : vector<2xf32> to vector<2x1xf32>
    %cst_59 = arith.constant 3.200000e+01 : f32
    %247 = vector.broadcast %cst_59 : f32 to vector<2x1xf32>
    %248 = arith.divf %246, %247 : vector<2x1xf32>
    %cst_60 = arith.constant 9.99999974E-6 : f32
    %249 = vector.broadcast %cst_60 : f32 to vector<2x1xf32>
    %250 = arith.addf %248, %249 : vector<2x1xf32>
    %251 = math.rsqrt %250 : vector<2x1xf32>
    %252 = vector.broadcast %251 : vector<2x1xf32> to vector<2x32xf32>
    %253 = arith.mulf %243, %252 : vector<2x32xf32>
    %254 = vector.broadcast %236 : vector<1x32xf32> to vector<2x32xf32>
    %255 = arith.mulf %253, %254 : vector<2x32xf32>
    %256 = vector.broadcast %237 : vector<1x32xf32> to vector<2x32xf32>
    %257 = arith.addf %255, %256 : vector<2x32xf32>
    %cst_61 = arith.constant 5.000000e-01 : f32
    %258 = vector.broadcast %cst_61 : f32 to vector<2x32xf32>
    %259 = arith.mulf %258, %257 : vector<2x32xf32>
    %260 = arith.mulf %257, %257 : vector<2x32xf32>
    %261 = arith.mulf %260, %257 : vector<2x32xf32>
    %cst_62 = arith.constant 4.471500e-02 : f32
    %262 = vector.broadcast %cst_62 : f32 to vector<2x32xf32>
    %263 = arith.mulf %262, %261 : vector<2x32xf32>
    %264 = arith.addf %257, %263 : vector<2x32xf32>
    %cst_63 = arith.constant 0.797884583 : f32
    %265 = vector.broadcast %cst_63 : f32 to vector<2x32xf32>
    %266 = arith.mulf %265, %264 : vector<2x32xf32>
    %267 = math.tanh %266 : vector<2x32xf32>
    %cst_64 = arith.constant 1.000000e+00 : f32
    %268 = vector.broadcast %cst_64 : f32 to vector<2x32xf32>
    %269 = arith.addf %268, %267 : vector<2x32xf32>
    %270 = arith.mulf %259, %269 : vector<2x32xf32>
    %271 = arith.addf %270, %230 : vector<2x32xf32>
    %c0_65 = arith.constant 0 : index
    %c0_66 = arith.constant 0 : index
    %272 = vector.load %arg4[%c0_65, %c0_66] : memref<2x32xf32, #tpu.memory_space<vmem>>, vector<2x32xf32>
    tpu.vector_store %arg4[%c0_65, %c0_66], %271 {strides = array<i32>} : memref<2x32xf32, #tpu.memory_space<vmem>>, vector<2x32xf32>,
    return
  }
  func.func @transform_0(%arg0: i32) -> (i32, i32) {
    %c0_i32 = arith.constant 0 : i32
    %c0_i32_0 = arith.constant 0 : i32
    %c0_i32_1 = arith.constant 0 : i32
    return %c0_i32, %c0_i32_0 : i32, i32
  }
  func.func @transform_1(%arg0: i32) -> (i32, i32) {
    %c0_i32 = arith.constant 0 : i32
    %c0_i32_0 = arith.constant 0 : i32
    %c0_i32_1 = arith.constant 0 : i32
    return %c0_i32, %c0_i32_0 : i32, i32
  }
  func.func @transform_2(%arg0: i32) -> (i32, i32) {
    %c0_i32 = arith.constant 0 : i32
    %c0_i32_0 = arith.constant 0 : i32
    %c0_i32_1 = arith.constant 0 : i32
    return %c0_i32, %c0_i32_0 : i32, i32
  }
  func.func @transform_3(%arg0: i32) -> (i32, i32) {
    %c0_i32 = arith.constant 0 : i32
    %c0_i32_0 = arith.constant 0 : i32
    %c0_i32_1 = arith.constant 0 : i32
    return %c0_i32, %c0_i32_0 : i32, i32
  }
}

</mosaic_0001>

<bundles_post_ra>
// kernel: forward.1
= control target key start
LH: loop header
LB: loop body
LE: loop exit
PB: predicated region body
PF: predicated region fallthrough
CT: control target
= control target key end

     0   :  { %8 = vsyncpa [#allocation3], 0  ;;  %s1379_s0 = inlined_call_operand.vmem [shape: f32[32,32], index: 0, kind: input, shape index: {}]   ;;  %s1380_s1 = inlined_call_operand.hbm [shape: f32[120,128], index: 1, kind: input, shape index: {}]   ;;  %s1381_s2 = inlined_call_operand.vmem [shape: f32[16,128], index: 2, kind: input, shape index: {}]   ;;  %s1382_s3 = inlined_call_operand.hbm [shape: f32[2,32], index: 3, kind: output, shape index: {}]  }
   0x1   :  { %9 = vsyncpa [#allocation4], 0  ;;  %s1153_s12 = smov [#allocation2]  }
   0x2   :  { %s17_s13 = sshll.u32 %s1153_s12, 4  ;;  %s18_s13 = int_to_ptr.vmem [resolvable:$true] %s17_s13 }
   0x3   :  { %s1117_s14 = scalar_lea.vmem %s18_s13, 1920  ;;  %p1122_p1 = scmp.lt.s32.totalorder %s18_s13, %s18_s13 }
   0x4   :  { %p1118_p0 = scmp.ne.s32.totalorder %s18_s13, %s1117_s14  ;;  %p1123_p2 = scmp.lt.s32.totalorder %s1117_s14, %s1117_s14 }
   0x6   :  { %p1124_p3 = por %p1123_p2, %p1122_p1 }
   0x8   :  { %p1125_p4 = pnand %p1124_p3, %p1118_p0 }
   0xa   :  { %1128 = shalt.err (!%p1125_p4)
}
   0xb   :  { %s1154_s15 = smov 128   ;;  %s1155_s16 = smov 8  }
   0xc   :  { %23 = dma.hbm_to_vmem [thread:$0]  %s1380_s1, 1920, %s18_s13, [#allocation3], %s1154_s15, %s1154_s15, %s1155_s16  }
   0xd   :  { %1149 = dma.done.wait [#allocation3], 1920  }
   0xe   :  { %1150 = vsyncadd [#allocation3], 4294965376  ;;  %vm35_vm0 = vcmask 261120   ;;  %v31_v0 = vld [vmem:[%s1379_s0] sm:$0xff]  ;;  %v32_v1 = vld [vmem:[%s1379_s0 + $0x8] sm:$0xff]  ;;  %v89_v37 = vlaneseq  ;;  %vm1157_vm1 = vmmov 0  }
   0xf   :  { %v33_v2 = vld [vmem:[%s1379_s0 + $0x10] sm:$0xff]  ;;  %v36_v3 = vsel %vm35_vm0, %v31_v0, 0.0  ;;  %v39_v4 = vsel %vm35_vm0, %v32_v1, 0.0  ;;  %v34_v5 = vld [vmem:[%s1379_s0 + $0x18] sm:$0xff]  ;;  %v1220_v43 = vld [vmem:[%s1381_s2] sm:$0xff]  ;;  %vm256_vm2 = vcmask 130048  }
  0x10   :  { %37 = vadd.xlane.f32.xlu0 %v36_v3  ;;  %40 = vadd.xlane.f32.xlu1 %v39_v4  ;;  %v42_v6 = vsel %vm35_vm0, %v33_v2, 0.0  ;;  %v45_v7 = vsel %vm35_vm0, %v34_v5, 0.0  ;;  %v1214_v41 = vshrl.u32 %v89_v37, 7  ;;  %v255_v37 = vld [vmem:[#allocation2 + $0x28] sm:$0xff]  ;;  %vm637_vm3 = vcmask 1040384   ;;  %s1163_s29 = smov 24  }
  0x11   :  { %1016 = vmatprep.subr.mxu1 %v255_v37  ;;  %vm750_vm4 = vcmask 1043456   ;;  %vm368_vm5 = vcmask 523264   ;;  %vm746_vm6 = vcmask 31744   ;;  %s1164_s30 = smov 32   ;;  %s1165_s4 = smov 40   ;;  %vm513_vm7 = vcmask 7168  }
  0x12   :  { %v91_v42 = vsub.s32 0, %v1214_v41  ;;  %v99_v47 = vsub.s32 1, %v1214_v41  ;;  %1017 = vmatpush3.msra.mxu1 %v255_v37  ;;  %s1166_s5 = smov 64   ;;  %vm418_vm8 = vcmp.lt.s32.totalorder %v1214_v41, 1  ;;  %s1167_s6 = smov 120   ;;  %vm439_vm9 = vcmp.lt.s32.totalorder %v1214_v41, 7 }
  0x13   :  { %vm395_vm10 = vcmp.lt.s32.totalorder %v1214_v41, 2  ;;  %vm561_vm11 = vcmask 64512   ;;  %vm460_vm12 = vcmp.lt.s32.totalorder %v1214_v41, 6  ;;  %s1168_s7 = smov 16   ;;  %vm843_vm13 = vcmask 195584   ;;  %s1169_s8 = smov [#allocation5]  }
  0x14   :  { %43 = vadd.xlane.f32.xlu0 %v42_v6  ;;  %46 = vadd.xlane.f32.xlu1 %v45_v7  ;;  %v92_v46 = vrot.slane %v1220_v43, %v91_v42  ;;  %v100_v52 = vrot.slane %v1220_v43, %v99_v47  ;;  %vm926_vm14 = vcmask 254976   ;;  %s967_s9 = sshll.u32 %s1169_s8, 4  ;;  %s968_s9 = int_to_ptr.vmem [resolvable:$true] %s967_s9 }
  0x15   :  { %s1129_s10 = scalar_lea.vmem %s968_s9, 32  ;;  %p1134_p6 = scmp.lt.s32.totalorder %s968_s9, %s968_s9 }
  0x16   :  { %p1130_p5 = scmp.ne.s32.totalorder %s968_s9, %s1129_s10  ;;  %p1135_p7 = scmp.lt.s32.totalorder %s1129_s10, %s1129_s10 }
  0x18   :  { %p1136_p8 = por %p1135_p7, %p1134_p6 }
  0x1a   :  { %p1137_p9 = pnand %p1136_p8, %p1130_p5 }
  0x99   :  { %v38_v8 = vpop.xlane.xlu0 %37  ;;  %v41_v9 = vpop.xlane.xlu1 %40 }
  0x9a   :  { %v49_v10 = vmul.f32 0.03125, %v38_v8  ;;  %v50_v11 = vmul.f32 0.03125, %v41_v9 }
  0x9c   :  { %v53_v12 = vsub.f32 %v31_v0, %v49_v10  ;;  %v54_v13 = vsub.f32 %v32_v1, %v50_v11 }
  0x9d   :  { %v44_v14 = vpop.xlane.xlu0 %43  ;;  %v47_v15 = vpop.xlane.xlu1 %46 }
  0x9e   :  { %v51_v16 = vmul.f32 0.03125, %v44_v14  ;;  %v52_v17 = vmul.f32 0.03125, %v47_v15  ;;  %v57_v18 = vmul.f32 %v53_v12, %v53_v12  ;;  %v58_v19 = vmul.f32 %v54_v13, %v54_v13  ;;  %v150_v15 = vld [vmem:[#allocation2 + $0x18] sm:$0xff] }
  0x9f   :  { %1005 = vmatprep.subr.mxu0 %v150_v15 }
  0xa0   :  { %v55_v20 = vsub.f32 %v33_v2, %v51_v16  ;;  %v56_v21 = vsub.f32 %v34_v5, %v52_v17  ;;  %v61_v22 = vsel %vm35_vm0, %v57_v18, 0.0  ;;  %v64_v23 = vsel %vm35_vm0, %v58_v19, 0.0  ;;  %v149_v16 = vld [vmem:[#allocation2 + $0x10] sm:$0xff]  ;;  %1006 = vmatpush3.msra.mxu0 %v150_v15  ;;  %v148_v17 = vld [vmem:[#allocation2 + $0x8] sm:$0xff]  ;;  %v147_v18 = vld [vmem:[#allocation2] sm:$0xff] }
  0xa1   :  { %62 = vadd.xlane.f32.xlu0 %v61_v22  ;;  %1007 = vmatprep.subr.mxu0 %v149_v16 }
  0xa2   :  { %v59_v24 = vmul.f32 %v55_v20, %v55_v20  ;;  %v60_v25 = vmul.f32 %v56_v21, %v56_v21  ;;  %1008 = vmatpush3.msra.mxu0 %v149_v16 }
  0xa3   :  { %1009 = vmatprep.subr.mxu0 %v148_v17 }
  0xa4   :  { %v67_v26 = vsel %vm35_vm0, %v59_v24, 0.0  ;;  %v70_v27 = vsel %vm35_vm0, %v60_v25, 0.0  ;;  %1010 = vmatpush3.msra.mxu0 %v148_v17  ;;  %v137_v25 = vsub.s32 2, %v1214_v41 }
  0xa5   :  { %65 = vadd.xlane.f32.xlu0 %v64_v23  ;;  %68 = vadd.xlane.f32.xlu1 %v67_v26  ;;  %v143_v26 = vsub.s32 3, %v1214_v41 }
  0xa6   :  { %1011 = vmatprep.subr.mxu0 %v147_v18 }
  0xa7   :  { %1012 = vmatpush3.msra.mxu0 %v147_v18 }
  0xa9   :  { %71 = vadd.xlane.f32.xlu1 %v70_v27  ;;  %v138_v27 = vrot.slane %v1220_v43, %v137_v25 }
 0x12a   :  { %v63_v28 = vpop.xlane.xlu0 %62 }
 0x12b   :  { %v73_v29 = vmul.f32 0.03125, %v63_v28 }
 0x12d   :  { %v77_v30 = vadd.f32 1e-05, %v73_v29 }
 0x12e   :  { %v69_v31 = vpop.xlane.xlu1 %68  ;;  %v66_v32 = vpop.xlane.xlu0 %65 }
 0x12f   :  { %1071 = vrsqrt.f32 %v77_v30  ;;  %v75_v33 = vmul.f32 0.03125, %v69_v31  ;;  %v74_v34 = vmul.f32 0.03125, %v66_v32  ;;  %v144_v30 = vrot.slane %v1220_v43, %v143_v26 }
 0x131   :  { %v79_v35 = vadd.f32 1e-05, %v75_v33  ;;  %v78_v36 = vadd.f32 1e-05, %v74_v34 }
 0x132   :  { %v72_v38 = vpop.xlane.xlu1 %71 }
 0x133   :  { %1073 = vrsqrt.f32 %v79_v35  ;;  %v76_v39 = vmul.f32 0.03125, %v72_v38  ;;  %v254_v38 = vld [vmem:[#allocation2 + $0x20] sm:$0xff] }
 0x134   :  { %1075 = vrsqrt.f32 %v78_v36  ;;  %1018 = vmatprep.subr.mxu1 %v254_v38 }
 0x135   :  { %v80_v40 = vadd.f32 1e-05, %v76_v39  ;;  %1019 = vmatpush3.msra.mxu1 %v254_v38  ;;  %v1156_v39 = vmov 0.0   ;;  %v1285_v38 = vld [vmem:[%s1381_s2 + $0x8] sm:$0xff]  ;;  %s1159_s2 = smov 56  }
 0x136   :  { %1023 = vmatprep.subr.mxu1 %v1156_v39  ;;  %1030 = vmatprep.subr.mxu0 %v1156_v39 }
 0x137   :  { %1077 = vrsqrt.f32 %v80_v40  ;;  %v153_v40 = vsub.s32 4, %v1214_v41 }
 0x13c   :  { %v1072_v44 = vpop.eup %1071 }
 0x13d   :  { %v85_v45 = vmul.f32 %v1072_v44, %v53_v12  ;;  %v154_v44 = vrot.slane %v1220_v43, %v153_v40 }
 0x13f   :  { %v93_v51 = vmul.f32 %v92_v46, %v85_v45 }
 0x140   :  { %v1074_v48 = vpop.eup %1073 }
 0x141   :  { %v1076_v49 = vpop.eup %1075  ;;  %v87_v50 = vmul.f32 %v1074_v48, %v55_v20  ;;  %v101_v56 = vadd.f32 %v100_v52, %v93_v51 }
 0x142   :  { %v86_v53 = vmul.f32 %v1076_v49, %v54_v13 }
 0x143   :  { %v95_v54 = vmul.f32 %v92_v46, %v87_v50 }
 0x144   :  { %v1078_v55 = vpop.eup %1077  ;;  %v94_v59 = vmul.f32 %v92_v46, %v86_v53 }
 0x145   :  { %v103_v57 = vadd.f32 %v100_v52, %v95_v54  ;;  %v88_v58 = vmul.f32 %v1078_v55, %v56_v21 }
 0x146   :  { %v102_v63 = vadd.f32 %v100_v52, %v94_v59 }
 0x147   :  { %v105_v60 = vadd.f32 %v103_v57, %v101_v56  ;;  %v96_v61 = vmul.f32 %v92_v46, %v88_v58 }
 0x149   :  { %v107_v62 = vmul.f32 2.0, %v105_v60  ;;  %v104_v0 = vadd.f32 %v100_v52, %v96_v61 }
 0x14b   :  { %v109_v1 = vsel %vm35_vm0, %v107_v62, 0.0  ;;  %v106_v2 = vadd.f32 %v104_v0, %v102_v63 }
 0x14c   :  { %110 = vadd.xlane.f32.xlu0 %v109_v1 }
 0x14d   :  { %v108_v3 = vmul.f32 2.0, %v106_v2 }
 0x14f   :  { %v112_v4 = vsel %vm35_vm0, %v108_v3, 0.0 }
 0x150   :  { %113 = vadd.xlane.f32.xlu1 %v112_v4 }
 0x1d5   :  { %v111_v5 = vpop.xlane.xlu0 %110 }
 0x1d6   :  { %v115_v6 = vmul.f32 0.03125, %v111_v5 }
 0x1d8   :  { %v117_v7 = vsub.f32 %v107_v62, %v115_v6  ;;  %v654_v6 = vld [vmem:[#allocation2 + $0x38] sm:$0xff] }
 0x1d9   :  { %v114_v8 = vpop.xlane.xlu1 %113 }
 0x1da   :  { %v116_v9 = vmul.f32 0.03125, %v114_v8  ;;  %v119_v10 = vmul.f32 %v117_v7, %v117_v7 }
 0x1dc   :  { %v118_v11 = vsub.f32 %v108_v3, %v116_v9  ;;  %v121_v12 = vsel %vm35_vm0, %v119_v10, 0.0  ;;  %v653_v9 = vld [vmem:[#allocation2 + $0x30] sm:$0xff] }
 0x1dd   :  { %122 = vadd.xlane.f32.xlu0 %v121_v12 }
 0x1de   :  { %v120_v13 = vmul.f32 %v118_v11, %v118_v11 }
 0x1e0   :  { %v124_v14 = vsel %vm35_vm0, %v120_v13, 0.0 }
 0x1e1   :  { %125 = vadd.xlane.f32.xlu1 %v124_v14 }
 0x266   :  { %v123_v19 = vpop.xlane.xlu0 %122 }
 0x267   :  { %v127_v20 = vmul.f32 0.03125, %v123_v19 }
 0x269   :  { %v129_v21 = vadd.f32 1e-05, %v127_v20 }
 0x26a   :  { %v126_v22 = vpop.xlane.xlu1 %125 }
 0x26b   :  { %1079 = vrsqrt.f32 %v129_v21  ;;  %v128_v23 = vmul.f32 0.03125, %v126_v22 }
 0x26d   :  { %v130_v24 = vadd.f32 1e-05, %v128_v23  ;;  %v741_v23 = vld [vmem:[#allocation2 + $0x40] sm:$0xf] }
 0x26f   :  { %1081 = vrsqrt.f32 %v130_v24  ;;  %v1158_v24 = vmov 1  }
 0x270   :  { %1064 = vset.pattern.permute.xlu1 %v1158_v24  ;;  %1063 = vset.pattern.permute.xlu0 %v1158_v24 }
 0x278   :  { %v1080_v28 = vpop.eup %1079 }
 0x279   :  { %v133_v29 = vmul.f32 %v1080_v28, %v117_v7 }
 0x27b   :  { %v139_v31 = vmul.f32 %v138_v27, %v133_v29 }
 0x27c   :  { %v1082_v32 = vpop.eup %1081 }
 0x27d   :  { %v134_v33 = vmul.f32 %v1082_v32, %v118_v11  ;;  %v145_v34 = vadd.f32 %v144_v30, %v139_v31 }
 0x27f   :  { %v140_v35 = vmul.f32 %v138_v27, %v134_v33  ;;  %1013 = vmatprep.mubr.msk.f32.mxu0 %vm35_vm0, %v145_v34  ;;  %v340_v27 = vsub.s32 7, %v1214_v41 }
 0x281   :  { %v146_v36 = vadd.f32 %v144_v30, %v140_v35  ;;  %v341_v28 = vrot.slane %v1220_v43, %v340_v27 }
 0x283   :  { %1014 = vmatmul.mubr.msk.f32.vlgmr.msra.gmra.mxu0 %vm35_vm0, %v146_v36 }
 0x284   :  { %1032 = vmatprep.mubr.msk.f32.mxu0 %vm1157_vm1, %v1156_v39  ;;  %1031 = vmatpush3.msk.msra.mxu0 %vm750_vm4, %v741_v23 }
 0x343   :  { %v1015_v45 = vpop.f32.mrf.mxu0 }
 0x344   :  { %v233_v46 = vadd.f32 %v1015_v45, %v154_v44 }
 0x345   :  { %v227_v48 = vpop.f32.mrf.mxu0 }
 0x346   :  { %v239_v49 = vmul.f32 %v233_v46, %v233_v46  ;;  %v228_v50 = vadd.f32 %v227_v48, %v154_v44  ;;  %v237_v61 = vmul.f32 0.5, %v233_v46 }
 0x348   :  { %v241_v51 = vmul.f32 %v239_v49, %v233_v46  ;;  %v238_v52 = vmul.f32 %v228_v50, %v228_v50  ;;  %v236_v0 = vmul.f32 0.5, %v228_v50  ;;  %v658_v49 = vrot.slane %v1285_v38, %v137_v25 }
 0x34a   :  { %v243_v53 = vmul.f32 0.044715, %v241_v51  ;;  %v240_v54 = vmul.f32 %v238_v52, %v228_v50 }
 0x34c   :  { %v245_v55 = vadd.f32 %v243_v53, %v233_v46  ;;  %v242_v56 = vmul.f32 0.044715, %v240_v54 }
 0x34e   :  { %v247_v57 = vmul.f32 0.7978846, %v245_v55  ;;  %v244_v58 = vadd.f32 %v242_v56, %v228_v50 }
 0x350   :  { %1083 = vtanh.f32 %v247_v57  ;;  %v246_v59 = vmul.f32 0.7978846, %v244_v58 }
 0x352   :  { %1085 = vtanh.f32 %v246_v59 }
 0x35d   :  { %v1084_v60 = vpop.eup %1083 }
 0x35e   :  { %v251_v62 = vadd.f32 1.0, %v1084_v60 }
 0x35f   :  { %v1086_v63 = vpop.eup %1085 }
 0x360   :  { %v250_v1 = vadd.f32 1.0, %v1086_v63  ;;  %v1251_v2 = vmul.f32 %v251_v62, %v237_v61  ;;  %v365_v62 = vrot.slane %v1285_v38, %v91_v42  ;;  %v382_v42 = vld [vmem:[#allocation2 + $0x70] sm:$0xff] }
 0x362   :  { %v1253_v3 = vmul.f32 %v250_v1, %v236_v0  ;;  %v615_v4 = vsel %vm256_vm2, %v1251_v2, 0.0 }
 0x363   :  { %v616_v5 = vrot.slane %v615_v4, 4 }
 0x364   :  { %1020 = vmatprep.mubr.msk.f32.mxu1 %vm256_vm2, %v1253_v3  ;;  %v553_v7 = vsel %vm256_vm2, %v1253_v3, 0.0 }
 0x365   :  { %v554_v8 = vrot.slane %v553_v7, 4  ;;  %1021 = vmatmul.mubr.msk.f32.vlgmr.msra.gmra.mxu1 %vm256_vm2, %v1251_v2  ;;  %v617_v10 = vadd.f32 %v616_v5, %v615_v4 }
 0x366   :  { %1024 = vmatpush3.msra.mxu1 %v654_v6  ;;  %1027 = vmatprep.mubr.msk.f32.mxu1 %vm1157_vm1, %v1156_v39 }
 0x367   :  { %1025 = vmatprep.subr.mxu1 %v1156_v39  ;;  %v555_v11 = vadd.f32 %v554_v8, %v553_v7  ;;  %v618_v12 = vrot.slane %v617_v10, 2 }
 0x368   :  { %1026 = vmatpush3.msra.mxu1 %v653_v9 }
 0x369   :  { %v556_v13 = vrot.slane %v555_v11, 2  ;;  %v619_v14 = vadd.f32 %v618_v12, %v617_v10  ;;  %1035 = vmatprep.subr.mxu1 %v1156_v39 }
 0x36b   :  { %v557_v15 = vadd.f32 %v556_v13, %v555_v11  ;;  %v620_v16 = vrot.slane %v619_v14, 1  ;;  %v381_v13 = vld [vmem:[#allocation2 + $0x68] sm:$0xff] }
 0x36d   :  { %v558_v17 = vrot.slane %v557_v15, 1  ;;  %v621_v18 = vadd.f32 %v620_v16, %v619_v14  ;;  %v1160_v14 = vmov 2   ;;  %v1162_v16 = vmov 0  }
 0x36f   :  { %v559_v19 = vadd.f32 %v558_v17, %v557_v15  ;;  %v622_v21 = vmul.f32 0.125, %v621_v18  ;;  %v1161_v15 = vmov 3   ;;  %v378_v17 = vrot.slane %v1285_v38, %v99_v47 }
 0x371   :  { %v560_v20 = vmul.f32 0.125, %v559_v19 }
 0x373   :  { %v1268_v22 = vsel %vm637_vm3, %v560_v20, %v622_v21 }
 0x374   :  { %1028 = vmatmul.mubr.msk.f32.vlgmr.msra.gmra.mxu1 %vm256_vm2, %v1268_v22 }
 0x375   :  { %1043 = vmatprep.mubr.msk.f32.mxu1 %vm1157_vm1, %v1156_v39 }
 0x425   :  { %v1276_v29 = vpop.f32.mrf.mxu1 }
 0x426   :  { %v343_v30 = vadd.f32 %v1276_v29, %v341_v28 }
 0x427   :  { %v1279_v31 = vpop.f32.mrf.mxu1 }
 0x428   :  { %v347_v32 = vmul.f32 %v343_v30, %v343_v30  ;;  %v342_v33 = vadd.f32 %v341_v28, %v1279_v31  ;;  %v345_v60 = vmul.f32 0.5, %v343_v30 }
 0x42a   :  { %v349_v34 = vmul.f32 %v347_v32, %v343_v30  ;;  %v346_v35 = vmul.f32 %v342_v33, %v342_v33  ;;  %v344_v0 = vmul.f32 0.5, %v342_v33 }
 0x42c   :  { %v351_v36 = vmul.f32 0.044715, %v349_v34  ;;  %v348_v37 = vmul.f32 %v346_v35, %v342_v33 }
 0x42e   :  { %v353_v44 = vadd.f32 %v351_v36, %v343_v30  ;;  %v350_v45 = vmul.f32 0.044715, %v348_v37 }
 0x430   :  { %v355_v46 = vmul.f32 0.7978846, %v353_v44  ;;  %v352_v48 = vadd.f32 %v350_v45, %v342_v33 }
 0x432   :  { %1087 = vtanh.f32 %v355_v46  ;;  %v354_v50 = vmul.f32 0.7978846, %v352_v48 }
 0x434   :  { %v728_v51 = vpop.f32.mrf.mxu1  ;;  %1089 = vtanh.f32 %v354_v50 }
 0x435   :  { %v729_v52 = vadd.f32 %v728_v51, %v658_v49 }
 0x436   :  { %v1029_v53 = vpop.f32.mrf.mxu1 }
 0x437   :  { %v733_v54 = vmul.f32 %v729_v52, %v729_v52  ;;  %v732_v10 = vmul.f32 0.5, %v729_v52 }
 0x439   :  { %v734_v55 = vmul.f32 %v733_v54, %v729_v52 }
 0x43b   :  { %v735_v56 = vmul.f32 0.044715, %v734_v55 }
 0x43d   :  { %v736_v57 = vadd.f32 %v735_v56, %v729_v52 }
 0x43f   :  { %v1088_v58 = vpop.eup %1087  ;;  %v737_v59 = vmul.f32 0.7978846, %v736_v57 }
 0x440   :  { %v359_v61 = vadd.f32 1.0, %v1088_v58 }
 0x441   :  { %v1090_v63 = vpop.eup %1089  ;;  %1091 = vtanh.f32 %v737_v59 }
 0x442   :  { %v361_v25 = vmul.f32 %v359_v61, %v345_v60  ;;  %v358_v1 = vadd.f32 1.0, %v1090_v63 }
 0x444   :  { %v367_v4 = vmul.f32 %v365_v62, %v361_v25  ;;  %v360_v5 = vmul.f32 %v358_v1, %v344_v0 }
 0x446   :  { %v372_v6 = vsel %vm368_vm5, %v367_v4, 0.0  ;;  %v366_v7 = vmul.f32 %v365_v62, %v360_v5 }
 0x447   :  { %373 = vadd.xlane.f32.xlu1 %v372_v6 }
 0x448   :  { %v369_v8 = vsel %vm368_vm5, %v366_v7, 0.0 }
 0x449   :  { %370 = vadd.xlane.f32.xlu0 %v369_v8 }
 0x44e   :  { %v1092_v9 = vpop.eup %1091 }
 0x44f   :  { %v739_v11 = vadd.f32 1.0, %v1092_v9 }
 0x451   :  { %v740_v12 = vmul.f32 %v739_v11, %v732_v10 }
 0x453   :  { %1033 = vmatmul.mubr.msk.f32.vlgmr.msra.gmra.mxu0 %vm746_vm6, %v740_v12 }
 0x458   :  { %426 = vperm.xlu1 %1064, %v382_v42  }
 0x45c   :  { %410 = vrot.lane.b32.xlu1 %v1279_v31, %s1159_s2 }
 0x45d   :  { %1065 = vset.pattern.permute.xlu1 %v1160_v14 }
 0x45f   :  { %422 = vperm.xlu0 %1063, %v381_v13  }
 0x460   :  { %412 = vrot.lane.b32.xlu1 %v1276_v29, %s1159_s2 }
 0x463   :  { %1067 = vset.pattern.permute.xlu0 %v1161_v15 }
 0x464   :  { %443 = vperm.xlu1 %1065, %v381_v13   ;;  %464 = vperm.xlu0 %1067, %v381_v13  }
 0x468   :  { %447 = vperm.xlu1 %1065, %v382_v42   ;;  %1068 = vset.pattern.permute.xlu0 %v1162_v16 }
 0x469   :  { %405 = vperm.xlu0 %1068, %v382_v42  }
 0x46c   :  { %431 = vrot.lane.b32.xlu1 %v1279_v31, %s1163_s29 }
 0x46d   :  { %454 = vrot.lane.b32.xlu0 %v1276_v29, %s1155_s16  ;;  %1066 = vset.pattern.permute.xlu1 %v1162_v16 }
 0x470   :  { %433 = vrot.lane.b32.xlu1 %v1276_v29, %s1163_s29 }
 0x471   :  { %495 = vrot.lane.b32.xlu0 %v1276_v29, %s1164_s30 }
 0x474   :  { %400 = vperm.xlu1 %1066, %v381_v13  }
 0x475   :  { %475 = vrot.lane.b32.xlu0 %v1276_v29, %s1165_s4 }
 0x478   :  { %385 = vrot.lane.b32.xlu1 %v1279_v31, %s1166_s5 }
 0x479   :  { %1069 = vset.pattern.permute.xlu1 %v1161_v15 }
 0x47c   :  { %387 = vrot.lane.b32.xlu1 %v1276_v29, %s1166_s5 }
 0x480   :  { %468 = vperm.xlu1 %1069, %v382_v42  }
 0x484   :  { %452 = vrot.lane.b32.xlu1 %v1279_v31, %s1155_s16 }
 0x485   :  { %1070 = vset.pattern.permute.xlu1 %v1162_v16 }
 0x488   :  { %493 = vrot.lane.b32.xlu1 %v1279_v31, %s1164_s30 }
 0x48c   :  { %473 = vrot.lane.b32.xlu1 %v1279_v31, %s1165_s4 }
 0x4d0   :  { %v374_v18 = vpop.xlane.xlu1 %373 }
 0x4d1   :  { %v380_v19 = vadd.f32 %v378_v17, %v374_v18 }
 0x4d2   :  { %v371_v20 = vpop.xlane.xlu0 %370 }
 0x4d3   :  { %v576_v21 = vsel %vm513_vm7, %v380_v19, -inf  ;;  %v379_v23 = vadd.f32 %v378_v17, %v371_v20 }
 0x4d4   :  { %v577_v24 = vrot.slane %v576_v21, 4  ;;  %v427_v27 = vpop.permute.xlu1 %426 }
 0x4d5   :  { %v514_v28 = vsel %vm513_vm7, %v379_v23, -inf }
 0x4d6   :  { %v578_v29 = vmax.f32 %v576_v21, %v577_v24  ;;  %v515_v30 = vrot.slane %v514_v28, 4 }
 0x4d8   :  { %v579_v32 = vrot.slane %v578_v29, 2  ;;  %v516_v33 = vmax.f32 %v514_v28, %v515_v30  ;;  %v411_v31 = vpop.permute.xlu1 %410 }
 0x4d9   :  { %v416_v45 = vrot.slane %v411_v31, 7 }
 0x4da   :  { %v580_v34 = vmax.f32 %v578_v29, %v579_v32  ;;  %v517_v35 = vrot.slane %v516_v33, 2  ;;  %v423_v36 = vpop.permute.xlu0 %422 }
 0x4dc   :  { %v581_v47 = vrot.slane %v580_v34, 1  ;;  %v518_v37 = vmax.f32 %v516_v33, %v517_v35  ;;  %v413_v44 = vpop.permute.xlu1 %412 }
 0x4dd   :  { %v417_v46 = vrot.slane %v413_v44, 7 }
 0x4de   :  { %v582_v48 = vmax.f32 %v580_v34, %v581_v47  ;;  %v519_v49 = vrot.slane %v518_v37, 1 }
 0x4df   :  { %v420_v50 = vsel %vm418_vm8, %v417_v46, %v416_v45  ;;  %v1315_v51 = vpop.permute.xlu0 %464  ;;  %v419_v52 = vsel %vm418_vm8, %v416_v45, %v417_v46 }
 0x4e0   :  { %v583_v53 = vsub.f32 %v380_v19, %v582_v48  ;;  %v520_v54 = vmax.f32 %v518_v37, %v519_v49  ;;  %v1317_v55 = vmul.f32 %v423_v36, %v420_v50  ;;  %v444_v56 = vpop.permute.xlu1 %443  ;;  %v430_v57 = vmul.f32 %v427_v27, %v419_v52 }
 0x4e2   :  { %v584_v58 = vmul.f32 1.442695, %v583_v53  ;;  %v521_v59 = vsub.f32 %v379_v23, %v520_v54  ;;  %487 = vrot.lane.b32.xlu0 %v430_v57, %s1167_s6  ;;  %485 = vrot.lane.b32.xlu1 %v1317_v55, %s1167_s6 }
 0x4e4   :  { %1093 = vpow2.f32 %v584_v58  ;;  %v522_v60 = vmul.f32 1.442695, %v521_v59  ;;  %v448_v61 = vpop.permute.xlu1 %447  ;;  %v406_v62 = vpop.permute.xlu0 %405 }
 0x4e6   :  { %1095 = vpow2.f32 %v522_v60 }
 0x4e8   :  { %v432_v63 = vpop.permute.xlu1 %431  ;;  %v455_v25 = vpop.permute.xlu0 %454 }
 0x4e9   :  { %v437_v1 = vrot.slane %v432_v63, 1  ;;  %v459_v48 = vrot.slane %v455_v25, 2 }
 0x4ec   :  { %v434_v0 = vpop.permute.xlu1 %433  ;;  %v1321_v6 = vpop.permute.xlu0 %495 }
 0x4ed   :  { %v438_v4 = vrot.slane %v434_v0, 1 }
 0x4ef   :  { %v441_v5 = vsel %vm439_vm9, %v438_v4, %v437_v1  ;;  %v440_v7 = vsel %vm439_vm9, %v437_v1, %v438_v4 }
 0x4f0   :  { %v401_v8 = vpop.permute.xlu1 %400  ;;  %v451_v9 = vmul.f32 %v448_v61, %v441_v5  ;;  %v450_v10 = vmul.f32 %v444_v56, %v440_v7  ;;  %v476_v18 = vpop.permute.xlu0 %475 }
 0x4f1   :  { %v1094_v11 = vpop.eup %1093  ;;  %v480_v21 = vadd.f32 %v476_v18, %v430_v57 }
 0x4f2   :  { %v586_v12 = vsel %vm513_vm7, %v1094_v11, 0.0  ;;  %505 = vrot.lane.b32.xlu0 %v451_v9, %s1167_s6  ;;  %503 = vrot.lane.b32.xlu1 %v450_v10, %s1167_s6 }
 0x4f3   :  { %v1096_v42 = vpop.eup %1095  ;;  %v587_v13 = vrot.slane %v586_v12, 4  ;;  %v482_v37 = vadd.f32 %v480_v21, %v451_v9  ;;  %v846_v21 = vld [vmem:[#allocation2 + $0x50] sm:$0xff] }
 0x4f4   :  { %v524_v14 = vsel %vm513_vm7, %v1096_v42, 0.0  ;;  %v386_v15 = vpop.permute.xlu1 %385 }
 0x4f5   :  { %v588_v16 = vadd.f32 %v587_v13, %v586_v12  ;;  %v525_v17 = vrot.slane %v524_v14, 4  ;;  %v391_v28 = vrot.slane %v386_v15, 6  ;;  %v623_v49 = vsel %vm561_vm11, %v482_v37, -inf }
 0x4f6   :  { %v624_v54 = vrot.slane %v623_v49, 4  ;;  %v644_v13 = vsub.s32 5, %v1214_v41 }
 0x4f7   :  { %v589_v19 = vrot.slane %v588_v16, 2  ;;  %v526_v20 = vadd.f32 %v525_v17, %v524_v14 }
 0x4f8   :  { %v388_v23 = vpop.permute.xlu1 %387  ;;  %v625_v59 = vmax.f32 %v623_v49, %v624_v54 }
 0x4f9   :  { %v590_v24 = vadd.f32 %v589_v19, %v588_v16  ;;  %v527_v27 = vrot.slane %v526_v20, 2  ;;  %v392_v29 = vrot.slane %v388_v23, 6  ;;  %v645_v16 = vrot.slane %v1220_v43, %v644_v13  ;;  %v848_v19 = vld [vmem:[#allocation2 + $0x60] sm:$0xff] }
 0x4fa   :  { %v626_v0 = vrot.slane %v625_v59, 2  ;;  %1036 = vmatpush3.msra.mxu1 %v848_v19 }
 0x4fb   :  { %v591_v30 = vrot.slane %v590_v24, 1  ;;  %v528_v32 = vadd.f32 %v527_v27, %v526_v20  ;;  %v397_v33 = vsel %vm395_vm10, %v392_v29, %v391_v28  ;;  %v396_v31 = vsel %vm395_vm10, %v391_v28, %v392_v29  ;;  %v847_v20 = vld [vmem:[#allocation2 + $0x58] sm:$0xff]  ;;  %1037 = vmatprep.subr.mxu1 %v1156_v39 }
 0x4fc   :  { %v469_v34 = vpop.permute.xlu1 %468  ;;  %v408_v35 = vmul.f32 %v401_v8, %v397_v33  ;;  %v409_v36 = vmul.f32 %v406_v62, %v396_v31  ;;  %v627_v8 = vmax.f32 %v625_v59, %v626_v0  ;;  %1038 = vmatpush3.msra.mxu1 %v847_v20 }
 0x4fd   :  { %v592_v47 = vadd.f32 %v591_v30, %v590_v24  ;;  %v529_v44 = vrot.slane %v528_v32, 1  ;;  %1039 = vmatprep.subr.mxu1 %v1156_v39 }
 0x4fe   :  { %v628_v14 = vrot.slane %v627_v8, 1  ;;  %1040 = vmatpush3.msra.mxu1 %v846_v21 }
 0x4ff   :  { %1097 = vrcp.f32 %v592_v47  ;;  %v530_v45 = vadd.f32 %v529_v44, %v528_v32  ;;  %1041 = vmatprep.subr.mxu1 %v1156_v39 }
 0x500   :  { %v453_v46 = vpop.permute.xlu1 %452  ;;  %v629_v17 = vmax.f32 %v627_v8, %v628_v14 }
 0x501   :  { %v458_v50 = vrot.slane %v453_v46, 2  ;;  %1099 = vrcp.f32 %v530_v45 }
 0x503   :  { %v461_v52 = vsel %vm460_vm12, %v458_v50, %v459_v48  ;;  %v462_v53 = vsel %vm460_vm12, %v459_v48, %v458_v50  ;;  %v845_v50 = vld [vmem:[#allocation2 + $0x48] sm:$0xff] }
 0x504   :  { %v494_v56 = vpop.permute.xlu1 %493  ;;  %v471_v57 = vmul.f32 %v1315_v51, %v461_v52  ;;  %v472_v58 = vmul.f32 %v469_v34, %v462_v53  ;;  %1042 = vmatpush3.msra.mxu1 %v845_v50  ;;  %v650_v52 = vsub.s32 6, %v1214_v41 }
 0x506   :  { %v651_v59 = vrot.slane %v1220_v43, %v650_v52 }
 0x508   :  { %v474_v60 = vpop.permute.xlu1 %473 }
 0x509   :  { %v479_v61 = vadd.f32 %v474_v60, %v1317_v55 }
 0x50b   :  { %v481_v62 = vadd.f32 %v479_v61, %v450_v10 }
 0x50c   :  { %v1098_v63 = vpop.eup %1097 }
 0x50d   :  { %v562_v25 = vsel %vm561_vm11, %v481_v62, -inf  ;;  %v594_v1 = vmul.f32 %v1098_v63, %v1094_v11 }
 0x50e   :  { %v1100_v4 = vpop.eup %1099  ;;  %v563_v5 = vrot.slane %v562_v25, 4 }
 0x50f   :  { %597 = vperm.xlu0 %1068, %v594_v1   ;;  %v532_v7 = vmul.f32 %v1100_v4, %v1096_v42 }
 0x510   :  { %v564_v9 = vmax.f32 %v562_v25, %v563_v5  ;;  %v608_v25 = vsel %vm256_vm2, %v1251_v2, -inf }
 0x511   :  { %535 = vperm.xlu1 %1070, %v532_v7   ;;  %v609_v4 = vrot.slane %v608_v25, 4 }
 0x512   :  { %v565_v12 = vrot.slane %v564_v9, 2 }
 0x513   :  { %v820_v51 = vpop.f32.mrf.mxu0  ;;  %v610_v7 = vmax.f32 %v608_v25, %v609_v4 }
 0x514   :  { %v566_v15 = vmax.f32 %v564_v9, %v565_v12 }
 0x515   :  { %v1034_v55 = vpop.f32.mrf.mxu0  ;;  %v611_v9 = vrot.slane %v610_v7, 2 }
 0x516   :  { %v567_v10 = vrot.slane %v566_v15, 1 }
 0x518   :  { %v568_v11 = vmax.f32 %v566_v15, %v567_v10 }
 0x51a   :  { %v641_v18 = vsel %vm637_vm3, %v568_v11, %v629_v17  ;;  %v612_v11 = vmax.f32 %v610_v7, %v611_v9 }
 0x51b   :  { %v646_v42 = vadd.f32 %v645_v16, %v641_v18 }
 0x51c   :  { %v613_v21 = vrot.slane %v612_v11, 1 }
 0x51d   :  { %835 = vrot.lane.b32.xlu1 %v646_v42, %s1168_s7 }
 0x554   :  { %v486_v23 = vpop.permute.xlu1 %485  ;;  %v488_v24 = vpop.permute.xlu0 %487 }
 0x555   :  { %v491_v27 = vadd.f32 %v486_v23, %v408_v35  ;;  %v492_v28 = vadd.f32 %v488_v24, %v409_v36 }
 0x557   :  { %v499_v29 = vadd.f32 %v494_v56, %v491_v27  ;;  %v500_v30 = vadd.f32 %v1321_v6, %v492_v28  ;;  %v745_v6 = vrot.slane %v1285_v38, %v143_v26  ;;  %v546_v26 = vsel %vm256_vm2, %v1253_v3, -inf }
 0x558   :  { %v547_v1 = vrot.slane %v546_v26, 4 }
 0x55a   :  { %v548_v5 = vmax.f32 %v546_v26, %v547_v1  ;;  %v948_v26 = vrot.slane %v1285_v38, %v650_v52 }
 0x55c   :  { %v549_v8 = vrot.slane %v548_v5, 2 }
 0x55e   :  { %v550_v15 = vmax.f32 %v548_v5, %v549_v8 }
 0x560   :  { %v551_v42 = vrot.slane %v550_v15, 1 }
 0x562   :  { %v552_v27 = vmax.f32 %v550_v15, %v551_v42 }
 0x564   :  { %v504_v32 = vpop.permute.xlu1 %503  ;;  %v506_v33 = vpop.permute.xlu0 %505 }
 0x565   :  { %v509_v31 = vadd.f32 %v504_v32, %v499_v29  ;;  %v510_v34 = vadd.f32 %v506_v33, %v500_v30  ;;  %v614_v29 = vmax.f32 %v612_v11, %v613_v21 }
 0x567   :  { %v511_v47 = vadd.f32 %v509_v31, %v471_v57  ;;  %v512_v37 = vadd.f32 %v510_v34, %v472_v58  ;;  %v821_v58 = vadd.f32 %v820_v51, %v745_v6  ;;  %v639_v33 = vsel %vm637_vm3, %v552_v27, %v614_v29 }
 0x568   :  { %v831_v31 = vadd.f32 %v1268_v22, %v639_v33  ;;  %v852_v22 = vrot.slane %v1285_v38, %v153_v40  ;;  %v943_v40 = vrot.slane %v1285_v38, %v644_v13 }
 0x569   :  { %v569_v44 = vsel %vm561_vm11, %v511_v47, -inf  ;;  %v630_v45 = vsel %vm561_vm11, %v512_v37, -inf  ;;  %v983_v63 = vmul.f32 -1.442695, %v821_v58 }
 0x56a   :  { %v570_v46 = vrot.slane %v569_v44, 4  ;;  %v631_v48 = vrot.slane %v630_v45, 4 }
 0x56b   :  { %1101 = vpow2.f32 %v983_v63 }
 0x56c   :  { %v571_v39 = vmax.f32 %v569_v44, %v570_v46  ;;  %v632_v49 = vmax.f32 %v630_v45, %v631_v48  ;;  %v832_v45 = vmul.f32 0.2, %v831_v31 }
 0x56e   :  { %v572_v35 = vrot.slane %v571_v39, 2  ;;  %v633_v36 = vrot.slane %v632_v49, 2 }
 0x570   :  { %v573_v53 = vmax.f32 %v571_v39, %v572_v35  ;;  %v634_v54 = vmax.f32 %v632_v49, %v633_v36 }
 0x572   :  { %v574_v56 = vrot.slane %v573_v53, 1  ;;  %v635_v57 = vrot.slane %v634_v54, 1 }
 0x574   :  { %v575_v60 = vmax.f32 %v573_v53, %v574_v56  ;;  %v636_v61 = vmax.f32 %v634_v54, %v635_v57 }
 0x576   :  { %v647_v62 = vsel %vm637_vm3, %v575_v60, %v636_v61 }
 0x577   :  { %v652_v0 = vadd.f32 %v651_v59, %v647_v62 }
 0x578   :  { %v1102_v43 = vpop.eup %1101 }
 0x579   :  { %839 = vrot.lane.b32.xlu1 %v652_v0, %s1163_s29  ;;  %v827_v51 = vadd.f32 1.0, %v1102_v43 }
 0x57b   :  { %1103 = vrcp.f32 %v827_v51 }
 0x588   :  { %v1104_v37 = vpop.eup %1103 }
 0x58a   :  { %v598_v12 = vpop.permute.xlu0 %597 }
 0x58b   :  { %v600_v14 = vmul.f32 %v598_v12, %v1251_v2 }
 0x58c   :  { %v536_v55 = vpop.permute.xlu1 %535 }
 0x58d   :  { %v601_v10 = vsel %vm256_vm2, %v600_v14, 0.0  ;;  %v538_v16 = vmul.f32 %v536_v55, %v1253_v3 }
 0x58e   :  { %v602_v17 = vrot.slane %v601_v10, 4 }
 0x58f   :  { %v539_v18 = vsel %vm256_vm2, %v538_v16, 0.0 }
 0x590   :  { %v603_v19 = vadd.f32 %v602_v17, %v601_v10  ;;  %v540_v20 = vrot.slane %v539_v18, 4  ;;  %v836_v39 = vpop.permute.xlu1 %835 }
 0x592   :  { %v604_v23 = vrot.slane %v603_v19, 2  ;;  %v541_v24 = vadd.f32 %v540_v20, %v539_v18 }
 0x594   :  { %v605_v28 = vadd.f32 %v604_v23, %v603_v19  ;;  %v542_v2 = vrot.slane %v541_v24, 2 }
 0x596   :  { %v606_v30 = vrot.slane %v605_v28, 1  ;;  %v543_v32 = vadd.f32 %v542_v2, %v541_v24 }
 0x598   :  { %v544_v3 = vrot.slane %v543_v32, 1  ;;  %v607_v34 = vadd.f32 %v606_v30, %v605_v28 }
 0x59a   :  { %v545_v47 = vadd.f32 %v544_v3, %v543_v32 }
 0x59c   :  { %v638_v44 = vsel %vm637_vm3, %v545_v47, %v607_v34 }
 0x59d   :  { %v830_v46 = vmul.f32 %v1104_v37, %v638_v44 }
 0x59f   :  { %v833_v48 = vadd.f32 %v832_v45, %v830_v46 }
 0x5a1   :  { %v842_v49 = vsel %vm256_vm2, %v833_v48, %v836_v39 }
 0x5eb   :  { %v840_v50 = vpop.permute.xlu1 %839 }
 0x5ec   :  { %v844_v35 = vsel %vm843_vm13, %v842_v49, %v840_v50 }
 0x5ed   :  { %1044 = vmatmul.mubr.msk.f32.vlgmr.msra.gmra.mxu1 %vm35_vm0, %v844_v35 }
 0x6ad   :  { %v922_v36 = vpop.f32.mrf.mxu1 }
 0x6ae   :  { %v923_v6 = vadd.f32 %v922_v36, %v852_v22 }
 0x6af   :  { %v1045_v53 = vpop.f32.mrf.mxu1 }
 0x6b0   :  { %v927_v54 = vsel %vm926_vm14, %v923_v6, 0.0 }
 0x6b1   :  { %928 = vadd.xlane.f32.xlu0 %v927_v54 }
 0x73a   :  { %v929_v56 = vpop.xlane.xlu0 %928 }
 0x73b   :  { %v930_v57 = vmul.f32 0.03125, %v929_v56 }
 0x73d   :  { %v931_v58 = vsub.f32 %v923_v6, %v930_v57 }
 0x73f   :  { %v932_v59 = vmul.f32 %v931_v58, %v931_v58 }
 0x741   :  { %v933_v60 = vsel %vm926_vm14, %v932_v59, 0.0 }
 0x742   :  { %934 = vadd.xlane.f32.xlu1 %v933_v60 }
 0x7cb   :  { %v935_v61 = vpop.xlane.xlu1 %934 }
 0x7cc   :  { %v936_v62 = vmul.f32 0.03125, %v935_v61 }
 0x7ce   :  { %v937_v63 = vadd.f32 1e-05, %v936_v62 }
 0x7d0   :  { %1105 = vrsqrt.f32 %v937_v63 }
 0x7dd   :  { %v1106_v0 = vpop.eup %1105 }
 0x7de   :  { %v939_v25 = vmul.f32 %v1106_v0, %v931_v58 }
 0x7e0   :  { %v944_v1 = vmul.f32 %v943_v40, %v939_v25 }
 0x7e2   :  { %v949_v4 = vadd.f32 %v948_v26, %v944_v1 }
 0x7e4   :  { %v951_v5 = vmul.f32 %v949_v4, %v949_v4  ;;  %v950_v51 = vmul.f32 0.5, %v949_v4 }
 0x7e6   :  { %v952_v7 = vmul.f32 %v951_v5, %v949_v4 }
 0x7e8   :  { %v953_v43 = vmul.f32 0.044715, %v952_v7 }
 0x7ea   :  { %v954_v8 = vadd.f32 %v953_v43, %v949_v4 }
 0x7ec   :  { %v955_v9 = vmul.f32 0.7978846, %v954_v8 }
 0x7ee   :  { %1107 = vtanh.f32 %v955_v9 }
 0x7fb   :  { %v1108_v12 = vpop.eup %1107 }
 0x7fc   :  { %v957_v14 = vadd.f32 1.0, %v1108_v12 }
 0x7fe   :  { %v958_v13 = vmul.f32 %v957_v14, %v950_v51 }
 0x800   :  { %v959_v15 = vadd.f32 %v958_v13, %v844_v35 }
 0x802   :  { %960 = vst.msk [vmem:[#allocation5] sm:$0x3] %vm926_vm14, %v959_v15 }
 0x803   :  { %1140 = shalt.err (!%p1137_p9)
}
 0x804   :  { %970 = dma.vmem_to_hbm [thread:$0]  %s968_s9, 32, %s1382_s3, [#allocation4]  }
 0x805   :  { %1151 = dma.done.wait [#allocation4], 32  }
 0x806   :  { %1152 = vsyncadd [#allocation4], 4294967264 }
 0x807   :  { %974 = vsyncpa [#allocation3], 1 }
 0x808   :  { %975 = vsyncpa [#allocation4], 1 }

</bundles_post_ra>
